<compile_context>
chip_gen: v7x
topology: tpu7x:2x2x1
jax: 0.10.0
libtpu: 0.0.40
codegen_flags: <defaults>
</compile_context>

<pallas_src>
import functools
from collections import namedtuple

import numpy as np

import jax
import jax.numpy as jnp
from jax import lax
from jax.experimental import pallas as pl
from jax.experimental.pallas import tpu as pltpu


Geom = namedtuple(
    "Geom",
    "c_in c_out k s p h w h_out w_out hq wq kps taps_h taps_w "
    "pad_top pad_left h_p w_p l_op")


def _phase_taps(k, s, p):
    """For each output phase r in [0, s): list of (kernel tap kh, input offset dh)."""
    taps = []
    for r in range(s):
        t = []
        for kk in range(k):
            if (kk - r - p) % s == 0:
                t.append((kk, (r + p - kk) // s))
        taps.append(t)
    return taps


def make_geom(c_in, c_out, k, stride, padding, h, w):
    """Static geometry shared by the (hoisted) weight packing and the kernel."""
    s, p = stride, padding
    assert s >= 1 and 0 <= p <= k - 1, "unsupported ConvTranspose2d config"
    assert k % s == 0 and (k - 2 * p) % s == 0, (
        "phase decomposition assumes k % stride == 0 and (k - 2*pad) % stride == 0")
    # TODO(synk): general k/stride/padding combos (ragged phases), output_padding,
    # dilation and groups are not implemented (the module spec doesn't use them).

    h_out = (h - 1) * s - 2 * p + k
    w_out = (w - 1) * s - 2 * p + k
    hq, wq = h_out // s, w_out // s
    kps = k // s

    taps_h = _phase_taps(k, s, p)
    taps_w = taps_h  # square kernel, same stride/padding in both dims

    dhs = [d for t in taps_h for (_, d) in t]
    dws = [d for t in taps_w for (_, d) in t]
    pad_top = max(0, -min(dhs))
    pad_bottom = max(0, max(dhs) + hq - h)
    pad_left = max(0, -min(dws))
    pad_right = max(0, max(dws) + wq - w)

    h_p = h + pad_top + pad_bottom
    w_p = w + pad_left + pad_right
    l_op = (c_in - 1) * w_p + wq            # widest lane window any shifted view needs

    return Geom(c_in, c_out, k, s, p, h, w, h_out, w_out, hq, wq, kps,
                tuple(tuple(t) for t in taps_h), tuple(tuple(t) for t in taps_w),
                pad_top, pad_left, h_p, w_p, l_op)


def pack_weights(weight, bias, g):
    """x-invariant parameter packing, done ONCE on the host (review #4).

    Returns:
      wv         : (s*s*kps*kps*c_out, l_op) f32 — per-(phase, tap, co) weight
                   rows; lane (ci*w_p + q) holds weight[ci, co, kh, kw].
      bias_lanes : (1, c_out*s*s*wq) f32 — bias[co] broadcast over the wq-wide
                   lane strip of every (rh, rw, co) output tile.
    """
    w = np.asarray(jax.device_get(weight), np.float32)
    b = np.asarray(jax.device_get(bias), np.float32)
    assert w.shape == (g.c_in, g.c_out, g.k, g.k)
    assert b.shape == (g.c_out,)

    n_rows = g.s * g.s * g.kps * g.kps * g.c_out
    wv = np.zeros((n_rows, g.l_op), np.float32)
    r = 0
    for rh in range(g.s):
        for rw in range(g.s):
            for (kh, _dh) in g.taps_h[rh]:
                for (kw, _dw) in g.taps_w[rw]:
                    for co in range(g.c_out):
                        for ci in range(g.c_in):
                            lo = ci * g.w_p
                            hi = min(lo + g.w_p, g.l_op)
                            wv[r, lo:hi] = w[ci, co, kh, kw]
                        r += 1
    assert r == n_rows

    n_lanes = g.c_out * g.s * g.s * g.wq
    bl = np.zeros((1, n_lanes), np.float32)
    for t in range(g.c_out * g.s * g.s):     # tile t = (rh*s + rw)*c_out + co
        bl[0, t * g.wq:(t + 1) * g.wq] = b[t % g.c_out]

    return jnp.asarray(wv), jnp.asarray(bl)


def _pick_batch_block(n, cap=8):
    """Amortize per-grid-step overhead (v5e/v6e serial grid) while keeping
    >= 2 parallel grid steps so both v7x TensorCores get work."""
    best = 1
    for nb in range(1, min(cap, n) + 1):
        if n % nb == 0 and n // nb >= 2:
            best = nb
    return best


def _dec_conv_kernel(wv_ref, b_ref, x_ref, o_ref, xpack_ref, *, g, n_blk):
    """n_blk batch elements per grid step.

    wv_ref    : VMEM (s*s*kps*kps*c_out, l_op)   per-(phase, tap, co) weight rows.
    b_ref     : VMEM (1, c_out*s*s*wq)           lane-packed bias.
    x_ref     : VMEM (n_blk, c_in, h, w)         raw NCHW input block.
    o_ref     : VMEM (n_blk, hq, c_out*s*s*wq)   lane-packed phase-tiled output.
    xpack_ref : VMEM (h_p, c_in*w_p)             scratch: halo-padded,
                                                 channel-lane-packed input.
    """
    # NOTE (review #11): loops are fully unrolled — fine at c_in=4 / c_out=3 /
    # n_blk<=8.  If channel counts or the batch block grow, switch the co/tap/b
    # loops to lax.fori_loop(..., unroll=True) over stacked VMEM accumulators
    # to bound live vreg ranges.
    c_in, c_out, s, kps = g.c_in, g.c_out, g.s, g.kps
    hq, wq, w_p, l_op = g.hq, g.wq, g.w_p, g.l_op

    # Zero the halo every step (megacore-safe: under "parallel" semantics a core
    # may never see program_id == 0, so no first-step-only init).  5 KB -> cheap.
    xpack_ref[...] = jnp.zeros(xpack_ref.shape, xpack_ref.dtype)

    for b in range(n_blk):
        # In-kernel input packing (review #3): interior writes, borders stay 0.
        for ci in range(c_in):
            xpack_ref[g.pad_top:g.pad_top + g.h,
                      ci * w_p + g.pad_left:ci * w_p + g.pad_left + g.w] = \
                x_ref[b, ci, :, :]

        for rh in range(s):
            for rw in range(s):
                accs = [jnp.zeros((hq, l_op), jnp.float32) for _ in range(c_out)]
                for th, (_, dh) in enumerate(g.taps_h[rh]):
                    for tw, (_, dw) in enumerate(g.taps_w[rw]):
                        r0 = g.pad_top + dh
                        c0 = g.pad_left + dw
                        # One shifted, channel-packed view feeds every (co, ci).
                        # (review #9: a shared aligned load + pltpu.roll would
                        # save a few vld; left as-is — low priority.)
                        xs = xpack_ref[r0:r0 + hq, c0:c0 + l_op]
                        base = (((rh * s + rw) * kps + th) * kps + tw) * c_out
                        for co in range(c_out):
                            wrow = wv_ref[base + co:base + co + 1, :]   # (1, l_op)
                            accs[co] = accs[co] + wrow * xs
                for co in range(c_out):
                    acc = accs[co]
                    # Sum the c_in lane strips (static lane slices).
                    red = acc[:, 0:wq]
                    for ci in range(1, c_in):
                        off = ci * w_p
                        red = red + acc[:, off:off + wq]
                    # Raw tile into its lane strip of the lane-dense output block.
                    t = (rh * s + rw) * c_out + co
                    o_ref[b, :, t * wq:(t + 1) * wq] = red

        # Single lane-packed bias add + single tanh + dense writeback (reviews #1/#8).
        o_ref[b, :, :] = jnp.tanh(o_ref[b, :, :] + b_ref[...])


def last_dec_conv(x, wv, bias_lanes, g):
    """ConvTranspose2d + tanh hot path: one pallas_call + one tiny output transpose.

    x          : (N, C_in, H, W) float32
    wv, bias_lanes : outputs of pack_weights() (x-invariant, hoisted).
    returns    : (N, C_out, H_out, W_out) float32
    """
    n, c_in, h, w = x.shape
    assert (c_in, h, w) == (g.c_in, g.h, g.w)

    n_blk = _pick_batch_block(n)
    assert n % n_blk == 0
    n_lanes = g.c_out * g.s * g.s * g.wq

    kernel = functools.partial(_dec_conv_kernel, g=g, n_blk=n_blk)

    yk = pl.pallas_call(
        kernel,
        out_shape=jax.ShapeDtypeStruct((n, g.hq, n_lanes), jnp.float32),
        grid=(n // n_blk,),
        in_specs=[
            pl.BlockSpec((wv.shape[0], g.l_op), lambda i: (0, 0)),     # weight rows
            pl.BlockSpec((1, n_lanes), lambda i: (0, 0)),              # lane-packed bias
            pl.BlockSpec((n_blk, g.c_in, g.h, g.w), lambda i: (i, 0, 0, 0)),  # raw NCHW x
        ],
        out_specs=pl.BlockSpec((n_blk, g.hq, n_lanes), lambda i: (i, 0, 0)),
        scratch_shapes=[pltpu.VMEM((g.h_p, g.c_in * g.w_p), jnp.float32)],
        compiler_params=pltpu.CompilerParams(dimension_semantics=("parallel",)),
    )(wv, bias_lanes, x.astype(jnp.float32))

    # Phase un-pack: (n, hq, rh, rw, co, wq) -> (n, co, h_out, w_out).
    # TODO(synk): fuse into the kernel (review #2) once an in-register lane
    # interleave is worth the lowering risk; kept as one small XLA transpose.
    y = yk.reshape(n, g.hq, g.s, g.s, g.c_out, g.wq)
    y = jnp.transpose(y, (0, 4, 1, 2, 5, 3)).reshape(n, g.c_out, g.h_out, g.w_out)
    return y


def _reference(x, weight, bias, *, stride, padding):
    """Pure-JAX reference for ConvTranspose2d + tanh (PyTorch semantics)."""
    _, c_out, k, _ = weight.shape
    pad = k - 1 - padding
    w_flip = jnp.transpose(weight[:, :, ::-1, ::-1], (1, 0, 2, 3))  # OIHW
    y = lax.conv_general_dilated(
        x,
        w_flip,
        window_strides=(1, 1),
        padding=[(pad, pad), (pad, pad)],
        lhs_dilation=(stride, stride),
        rhs_dilation=(1, 1),
        dimension_numbers=("NCHW", "OIHW", "NCHW"),
    )
    return jnp.tanh(y + bias[None, :, None, None])


if __name__ == "__main__":
    # LastDecConv(in_channels=4, out_channels=3, kernel_size=4, stride=2, padding=1)
    N, C_IN, H, W = 2, 4, 16, 16
    C_OUT, K, STRIDE, PADDING = 3, 4, 2, 1

    key = jax.random.PRNGKey(0)
    kx, kw, kb = jax.random.split(key, 3)
    x = jax.random.normal(kx, (N, C_IN, H, W), dtype=jnp.float32)
    fan_in = C_IN * K * K
    bound = 1.0 / (fan_in ** 0.5)
    weight = jax.random.uniform(kw, (C_IN, C_OUT, K, K), jnp.float32, -bound, bound)
    bias = jax.random.uniform(kb, (C_OUT,), jnp.float32, -bound, bound)

    geom = make_geom(C_IN, C_OUT, K, STRIDE, PADDING, H, W)
    # Hoisted, x-invariant parameter packing (done once, outside the hot path).
    wv, bias_lanes = pack_weights(weight, bias, geom)

    fwd = jax.jit(lambda xx, ww, bb: last_dec_conv(xx, ww, bb, geom))
    out = jax.block_until_ready(fwd(x, wv, bias_lanes))

    ref = _reference(x, weight, bias, stride=STRIDE, padding=PADDING)
    assert out.shape == (N, C_OUT, 2 * H, 2 * W), out.shape
    err = float(jnp.max(jnp.abs(out - ref)))
    assert jnp.allclose(out, ref, atol=1e-5, rtol=1e-5), err

    print("KERNEL_OK")
</pallas_src>

<mosaic_0001>
module attributes {stable_mosaic.version = 11 : i64} {
  func.func @_dec_conv_kernel(%arg0: i32, %arg1: memref<48x70xf32, #tpu.memory_space<vmem>>, %arg2: memref<1x192xf32, #tpu.memory_space<vmem>>, %arg3: memref<1x4x16x16xf32, #tpu.memory_space<vmem>>, %arg4: memref<1x16x192xf32, #tpu.memory_space<vmem>>, %arg5: memref<18x72xf32, #tpu.memory_space<vmem>>) attributes {dimension_semantics = [#tpu.dimension_semantics<parallel>], iteration_bounds = array<i64: 2>, scalar_prefetch = 0 : i64, scratch_operands = 1 : i64, tpu.core_type = #tpu.core_type<tc>, window_params = [{pipeline_mode = #tpu.pipeline_mode<synchronous>, transform_indices = @transform_0, window_bounds = array<i64: 48, 70>}, {pipeline_mode = #tpu.pipeline_mode<synchronous>, transform_indices = @transform_1, window_bounds = array<i64: 1, 192>}, {transform_indices = @transform_2, window_bounds = array<i64: 1, 4, 16, 16>}, {transform_indices = @transform_3, window_bounds = array<i64: 1, 16, 192>}]} {
    %cst = arith.constant 0.000000e+00 : f32
    %0 = vector.broadcast %cst : f32 to vector<18x72xf32>
    %c0 = arith.constant 0 : index
    %c0_0 = arith.constant 0 : index
    %1 = vector.load %arg5[%c0, %c0_0] : memref<18x72xf32, #tpu.memory_space<vmem>>, vector<18x72xf32>
    tpu.vector_store %arg5[%c0, %c0_0], %0 {strides = array<i32>} : memref<18x72xf32, #tpu.memory_space<vmem>>, vector<18x72xf32>,
    %c0_1 = arith.constant 0 : index
    %c0_2 = arith.constant 0 : index
    %c0_3 = arith.constant 0 : index
    %c0_4 = arith.constant 0 : index
    %2 = vector.load %arg3[%c0_1, %c0_2, %c0_3, %c0_4] : memref<1x4x16x16xf32, #tpu.memory_space<vmem>>, vector<1x1x16x16xf32>
    %3 = vector.shape_cast %2 : vector<1x1x16x16xf32> to vector<16x16xf32>
    %c1 = arith.constant 1 : index
    %c1_5 = arith.constant 1 : index
    %4 = vector.load %arg5[%c1, %c1_5] : memref<18x72xf32, #tpu.memory_space<vmem>>, vector<16x16xf32>
    tpu.vector_store %arg5[%c1, %c1_5], %3 {strides = array<i32>} : memref<18x72xf32, #tpu.memory_space<vmem>>, vector<16x16xf32>,
    %c0_6 = arith.constant 0 : index
    %c1_7 = arith.constant 1 : index
    %c0_8 = arith.constant 0 : index
    %c0_9 = arith.constant 0 : index
    %5 = vector.load %arg3[%c0_6, %c1_7, %c0_8, %c0_9] : memref<1x4x16x16xf32, #tpu.memory_space<vmem>>, vector<1x1x16x16xf32>
    %6 = vector.shape_cast %5 : vector<1x1x16x16xf32> to vector<16x16xf32>
    %c1_10 = arith.constant 1 : index
    %c19 = arith.constant 19 : index
    %7 = vector.load %arg5[%c1_10, %c19] : memref<18x72xf32, #tpu.memory_space<vmem>>, vector<16x16xf32>
    tpu.vector_store %arg5[%c1_10, %c19], %6 {strides = array<i32>} : memref<18x72xf32, #tpu.memory_space<vmem>>, vector<16x16xf32>,
    %c0_11 = arith.constant 0 : index
    %c2 = arith.constant 2 : index
    %c0_12 = arith.constant 0 : index
    %c0_13 = arith.constant 0 : index
    %8 = vector.load %arg3[%c0_11, %c2, %c0_12, %c0_13] : memref<1x4x16x16xf32, #tpu.memory_space<vmem>>, vector<1x1x16x16xf32>
    %9 = vector.shape_cast %8 : vector<1x1x16x16xf32> to vector<16x16xf32>
    %c1_14 = arith.constant 1 : index
    %c37 = arith.constant 37 : index
    %10 = vector.load %arg5[%c1_14, %c37] : memref<18x72xf32, #tpu.memory_space<vmem>>, vector<16x16xf32>
    tpu.vector_store %arg5[%c1_14, %c37], %9 {strides = array<i32>} : memref<18x72xf32, #tpu.memory_space<vmem>>, vector<16x16xf32>,
    %c0_15 = arith.constant 0 : index
    %c3 = arith.constant 3 : index
    %c0_16 = arith.constant 0 : index
    %c0_17 = arith.constant 0 : index
    %11 = vector.load %arg3[%c0_15, %c3, %c0_16, %c0_17] : memref<1x4x16x16xf32, #tpu.memory_space<vmem>>, vector<1x1x16x16xf32>
    %12 = vector.shape_cast %11 : vector<1x1x16x16xf32> to vector<16x16xf32>
    %c1_18 = arith.constant 1 : index
    %c55 = arith.constant 55 : index
    %13 = vector.load %arg5[%c1_18, %c55] : memref<18x72xf32, #tpu.memory_space<vmem>>, vector<16x16xf32>
    tpu.vector_store %arg5[%c1_18, %c55], %12 {strides = array<i32>} : memref<18x72xf32, #tpu.memory_space<vmem>>, vector<16x16xf32>,
    %cst_19 = arith.constant 0.000000e+00 : f32
    %14 = vector.broadcast %cst_19 : f32 to vector<16x70xf32>
    %cst_20 = arith.constant 0.000000e+00 : f32
    %15 = vector.broadcast %cst_20 : f32 to vector<16x70xf32>
    %cst_21 = arith.constant 0.000000e+00 : f32
    %16 = vector.broadcast %cst_21 : f32 to vector<16x70xf32>
    %c1_22 = arith.constant 1 : index
    %c1_23 = arith.constant 1 : index
    %17 = vector.load %arg5[%c1_22, %c1_23] : memref<18x72xf32, #tpu.memory_space<vmem>>, vector<16x70xf32>
    %c0_24 = arith.constant 0 : index
    %c0_25 = arith.constant 0 : index
    %18 = vector.load %arg1[%c0_24, %c0_25] : memref<48x70xf32, #tpu.memory_space<vmem>>, vector<1x70xf32>
    %19 = vector.broadcast %18 : vector<1x70xf32> to vector<16x70xf32>
    %20 = arith.mulf %19, %17 : vector<16x70xf32>
    %21 = arith.addf %14, %20 : vector<16x70xf32>
    %c1_26 = arith.constant 1 : index
    %c0_27 = arith.constant 0 : index
    %22 = vector.load %arg1[%c1_26, %c0_27] : memref<48x70xf32, #tpu.memory_space<vmem>>, vector<1x70xf32>
    %23 = vector.broadcast %22 : vector<1x70xf32> to vector<16x70xf32>
    %24 = arith.mulf %23, %17 : vector<16x70xf32>
    %25 = arith.addf %15, %24 : vector<16x70xf32>
    %c2_28 = arith.constant 2 : index
    %c0_29 = arith.constant 0 : index
    %26 = vector.load %arg1[%c2_28, %c0_29] : memref<48x70xf32, #tpu.memory_space<vmem>>, vector<1x70xf32>
    %27 = vector.broadcast %26 : vector<1x70xf32> to vector<16x70xf32>
    %28 = arith.mulf %27, %17 : vector<16x70xf32>
    %29 = arith.addf %16, %28 : vector<16x70xf32>
    %c1_30 = arith.constant 1 : index
    %c0_31 = arith.constant 0 : index
    %30 = vector.load %arg5[%c1_30, %c0_31] : memref<18x72xf32, #tpu.memory_space<vmem>>, vector<16x70xf32>
    %c3_32 = arith.constant 3 : index
    %c0_33 = arith.constant 0 : index
    %31 = vector.load %arg1[%c3_32, %c0_33] : memref<48x70xf32, #tpu.memory_space<vmem>>, vector<1x70xf32>
    %32 = vector.broadcast %31 : vector<1x70xf32> to vector<16x70xf32>
    %33 = arith.mulf %32, %30 : vector<16x70xf32>
    %34 = arith.addf %21, %33 : vector<16x70xf32>
    %c4 = arith.constant 4 : index
    %c0_34 = arith.constant 0 : index
    %35 = vector.load %arg1[%c4, %c0_34] : memref<48x70xf32, #tpu.memory_space<vmem>>, vector<1x70xf32>
    %36 = vector.broadcast %35 : vector<1x70xf32> to vector<16x70xf32>
    %37 = arith.mulf %36, %30 : vector<16x70xf32>
    %38 = arith.addf %25, %37 : vector<16x70xf32>
    %c5 = arith.constant 5 : index
    %c0_35 = arith.constant 0 : index
    %39 = vector.load %arg1[%c5, %c0_35] : memref<48x70xf32, #tpu.memory_space<vmem>>, vector<1x70xf32>
    %40 = vector.broadcast %39 : vector<1x70xf32> to vector<16x70xf32>
    %41 = arith.mulf %40, %30 : vector<16x70xf32>
    %42 = arith.addf %29, %41 : vector<16x70xf32>
    %c0_36 = arith.constant 0 : index
    %c1_37 = arith.constant 1 : index
    %43 = vector.load %arg5[%c0_36, %c1_37] : memref<18x72xf32, #tpu.memory_space<vmem>>, vector<16x70xf32>
    %c6 = arith.constant 6 : index
    %c0_38 = arith.constant 0 : index
    %44 = vector.load %arg1[%c6, %c0_38] : memref<48x70xf32, #tpu.memory_space<vmem>>, vector<1x70xf32>
    %45 = vector.broadcast %44 : vector<1x70xf32> to vector<16x70xf32>
    %46 = arith.mulf %45, %43 : vector<16x70xf32>
    %47 = arith.addf %34, %46 : vector<16x70xf32>
    %c7 = arith.constant 7 : index
    %c0_39 = arith.constant 0 : index
    %48 = vector.load %arg1[%c7, %c0_39] : memref<48x70xf32, #tpu.memory_space<vmem>>, vector<1x70xf32>
    %49 = vector.broadcast %48 : vector<1x70xf32> to vector<16x70xf32>
    %50 = arith.mulf %49, %43 : vector<16x70xf32>
    %51 = arith.addf %38, %50 : vector<16x70xf32>
    %c8 = arith.constant 8 : index
    %c0_40 = arith.constant 0 : index
    %52 = vector.load %arg1[%c8, %c0_40] : memref<48x70xf32, #tpu.memory_space<vmem>>, vector<1x70xf32>
    %53 = vector.broadcast %52 : vector<1x70xf32> to vector<16x70xf32>
    %54 = arith.mulf %53, %43 : vector<16x70xf32>
    %55 = arith.addf %42, %54 : vector<16x70xf32>
    %c0_41 = arith.constant 0 : index
    %c0_42 = arith.constant 0 : index
    %56 = vector.load %arg5[%c0_41, %c0_42] : memref<18x72xf32, #tpu.memory_space<vmem>>, vector<16x70xf32>
    %c9 = arith.constant 9 : index
    %c0_43 = arith.constant 0 : index
    %57 = vector.load %arg1[%c9, %c0_43] : memref<48x70xf32, #tpu.memory_space<vmem>>, vector<1x70xf32>
    %58 = vector.broadcast %57 : vector<1x70xf32> to vector<16x70xf32>
    %59 = arith.mulf %58, %56 : vector<16x70xf32>
    %60 = arith.addf %47, %59 : vector<16x70xf32>
    %c10 = arith.constant 10 : index
    %c0_44 = arith.constant 0 : index
    %61 = vector.load %arg1[%c10, %c0_44] : memref<48x70xf32, #tpu.memory_space<vmem>>, vector<1x70xf32>
    %62 = vector.broadcast %61 : vector<1x70xf32> to vector<16x70xf32>
    %63 = arith.mulf %62, %56 : vector<16x70xf32>
    %64 = arith.addf %51, %63 : vector<16x70xf32>
    %c11 = arith.constant 11 : index
    %c0_45 = arith.constant 0 : index
    %65 = vector.load %arg1[%c11, %c0_45] : memref<48x70xf32, #tpu.memory_space<vmem>>, vector<1x70xf32>
    %66 = vector.broadcast %65 : vector<1x70xf32> to vector<16x70xf32>
    %67 = arith.mulf %66, %56 : vector<16x70xf32>
    %68 = arith.addf %55, %67 : vector<16x70xf32>
    %69 = vector.extract_strided_slice %60 {offsets = [0, 0], sizes = [16, 16], strides = [1, 1]} : vector<16x70xf32> to vector<16x16xf32>
    %70 = vector.extract_strided_slice %60 {offsets = [0, 18], sizes = [16, 16], strides = [1, 1]} : vector<16x70xf32> to vector<16x16xf32>
    %71 = arith.addf %69, %70 : vector<16x16xf32>
    %72 = vector.extract_strided_slice %60 {offsets = [0, 36], sizes = [16, 16], strides = [1, 1]} : vector<16x70xf32> to vector<16x16xf32>
    %73 = arith.addf %71, %72 : vector<16x16xf32>
    %74 = vector.extract_strided_slice %60 {offsets = [0, 54], sizes = [16, 16], strides = [1, 1]} : vector<16x70xf32> to vector<16x16xf32>
    %75 = arith.addf %73, %74 : vector<16x16xf32>
    %c0_46 = arith.constant 0 : index
    %c0_47 = arith.constant 0 : index
    %c0_48 = arith.constant 0 : index
    %76 = vector.load %arg4[%c0_46, %c0_47, %c0_48] : memref<1x16x192xf32, #tpu.memory_space<vmem>>, vector<1x16x16xf32>
    %77 = vector.shape_cast %76 : vector<1x16x16xf32> to vector<16x16xf32>
    %78 = vector.shape_cast %75 : vector<16x16xf32> to vector<1x16x16xf32>
    tpu.vector_store %arg4[%c0_46, %c0_47, %c0_48], %78 {strides = array<i32>} : memref<1x16x192xf32, #tpu.memory_space<vmem>>, vector<1x16x16xf32>,
    %79 = vector.extract_strided_slice %64 {offsets = [0, 0], sizes = [16, 16], strides = [1, 1]} : vector<16x70xf32> to vector<16x16xf32>
    %80 = vector.extract_strided_slice %64 {offsets = [0, 18], sizes = [16, 16], strides = [1, 1]} : vector<16x70xf32> to vector<16x16xf32>
    %81 = arith.addf %79, %80 : vector<16x16xf32>
    %82 = vector.extract_strided_slice %64 {offsets = [0, 36], sizes = [16, 16], strides = [1, 1]} : vector<16x70xf32> to vector<16x16xf32>
    %83 = arith.addf %81, %82 : vector<16x16xf32>
    %84 = vector.extract_strided_slice %64 {offsets = [0, 54], sizes = [16, 16], strides = [1, 1]} : vector<16x70xf32> to vector<16x16xf32>
    %85 = arith.addf %83, %84 : vector<16x16xf32>
    %c0_49 = arith.constant 0 : index
    %c0_50 = arith.constant 0 : index
    %c16 = arith.constant 16 : index
    %86 = vector.load %arg4[%c0_49, %c0_50, %c16] : memref<1x16x192xf32, #tpu.memory_space<vmem>>, vector<1x16x16xf32>
    %87 = vector.shape_cast %86 : vector<1x16x16xf32> to vector<16x16xf32>
    %88 = vector.shape_cast %85 : vector<16x16xf32> to vector<1x16x16xf32>
    tpu.vector_store %arg4[%c0_49, %c0_50, %c16], %88 {strides = array<i32>} : memref<1x16x192xf32, #tpu.memory_space<vmem>>, vector<1x16x16xf32>,
    %89 = vector.extract_strided_slice %68 {offsets = [0, 0], sizes = [16, 16], strides = [1, 1]} : vector<16x70xf32> to vector<16x16xf32>
    %90 = vector.extract_strided_slice %68 {offsets = [0, 18], sizes = [16, 16], strides = [1, 1]} : vector<16x70xf32> to vector<16x16xf32>
    %91 = arith.addf %89, %90 : vector<16x16xf32>
    %92 = vector.extract_strided_slice %68 {offsets = [0, 36], sizes = [16, 16], strides = [1, 1]} : vector<16x70xf32> to vector<16x16xf32>
    %93 = arith.addf %91, %92 : vector<16x16xf32>
    %94 = vector.extract_strided_slice %68 {offsets = [0, 54], sizes = [16, 16], strides = [1, 1]} : vector<16x70xf32> to vector<16x16xf32>
    %95 = arith.addf %93, %94 : vector<16x16xf32>
    %c0_51 = arith.constant 0 : index
    %c0_52 = arith.constant 0 : index
    %c32 = arith.constant 32 : index
    %96 = vector.load %arg4[%c0_51, %c0_52, %c32] : memref<1x16x192xf32, #tpu.memory_space<vmem>>, vector<1x16x16xf32>
    %97 = vector.shape_cast %96 : vector<1x16x16xf32> to vector<16x16xf32>
    %98 = vector.shape_cast %95 : vector<16x16xf32> to vector<1x16x16xf32>
    tpu.vector_store %arg4[%c0_51, %c0_52, %c32], %98 {strides = array<i32>} : memref<1x16x192xf32, #tpu.memory_space<vmem>>, vector<1x16x16xf32>,
    %cst_53 = arith.constant 0.000000e+00 : f32
    %99 = vector.broadcast %cst_53 : f32 to vector<16x70xf32>
    %cst_54 = arith.constant 0.000000e+00 : f32
    %100 = vector.broadcast %cst_54 : f32 to vector<16x70xf32>
    %cst_55 = arith.constant 0.000000e+00 : f32
    %101 = vector.broadcast %cst_55 : f32 to vector<16x70xf32>
    %c1_56 = arith.constant 1 : index
    %c2_57 = arith.constant 2 : index
    %102 = vector.load %arg5[%c1_56, %c2_57] : memref<18x72xf32, #tpu.memory_space<vmem>>, vector<16x70xf32>
    %c12 = arith.constant 12 : index
    %c0_58 = arith.constant 0 : index
    %103 = vector.load %arg1[%c12, %c0_58] : memref<48x70xf32, #tpu.memory_space<vmem>>, vector<1x70xf32>
    %104 = vector.broadcast %103 : vector<1x70xf32> to vector<16x70xf32>
    %105 = arith.mulf %104, %102 : vector<16x70xf32>
    %106 = arith.addf %99, %105 : vector<16x70xf32>
    %c13 = arith.constant 13 : index
    %c0_59 = arith.constant 0 : index
    %107 = vector.load %arg1[%c13, %c0_59] : memref<48x70xf32, #tpu.memory_space<vmem>>, vector<1x70xf32>
    %108 = vector.broadcast %107 : vector<1x70xf32> to vector<16x70xf32>
    %109 = arith.mulf %108, %102 : vector<16x70xf32>
    %110 = arith.addf %100, %109 : vector<16x70xf32>
    %c14 = arith.constant 14 : index
    %c0_60 = arith.constant 0 : index
    %111 = vector.load %arg1[%c14, %c0_60] : memref<48x70xf32, #tpu.memory_space<vmem>>, vector<1x70xf32>
    %112 = vector.broadcast %111 : vector<1x70xf32> to vector<16x70xf32>
    %113 = arith.mulf %112, %102 : vector<16x70xf32>
    %114 = arith.addf %101, %113 : vector<16x70xf32>
    %c1_61 = arith.constant 1 : index
    %c1_62 = arith.constant 1 : index
    %115 = vector.load %arg5[%c1_61, %c1_62] : memref<18x72xf32, #tpu.memory_space<vmem>>, vector<16x70xf32>
    %c15 = arith.constant 15 : index
    %c0_63 = arith.constant 0 : index
    %116 = vector.load %arg1[%c15, %c0_63] : memref<48x70xf32, #tpu.memory_space<vmem>>, vector<1x70xf32>
    %117 = vector.broadcast %116 : vector<1x70xf32> to vector<16x70xf32>
    %118 = arith.mulf %117, %115 : vector<16x70xf32>
    %119 = arith.addf %106, %118 : vector<16x70xf32>
    %c16_64 = arith.constant 16 : index
    %c0_65 = arith.constant 0 : index
    %120 = vector.load %arg1[%c16_64, %c0_65] : memref<48x70xf32, #tpu.memory_space<vmem>>, vector<1x70xf32>
    %121 = vector.broadcast %120 : vector<1x70xf32> to vector<16x70xf32>
    %122 = arith.mulf %121, %115 : vector<16x70xf32>
    %123 = arith.addf %110, %122 : vector<16x70xf32>
    %c17 = arith.constant 17 : index
    %c0_66 = arith.constant 0 : index
    %124 = vector.load %arg1[%c17, %c0_66] : memref<48x70xf32, #tpu.memory_space<vmem>>, vector<1x70xf32>
    %125 = vector.broadcast %124 : vector<1x70xf32> to vector<16x70xf32>
    %126 = arith.mulf %125, %115 : vector<16x70xf32>
    %127 = arith.addf %114, %126 : vector<16x70xf32>
    %c0_67 = arith.constant 0 : index
    %c2_68 = arith.constant 2 : index
    %128 = vector.load %arg5[%c0_67, %c2_68] : memref<18x72xf32, #tpu.memory_space<vmem>>, vector<16x70xf32>
    %c18 = arith.constant 18 : index
    %c0_69 = arith.constant 0 : index
    %129 = vector.load %arg1[%c18, %c0_69] : memref<48x70xf32, #tpu.memory_space<vmem>>, vector<1x70xf32>
    %130 = vector.broadcast %129 : vector<1x70xf32> to vector<16x70xf32>
    %131 = arith.mulf %130, %128 : vector<16x70xf32>
    %132 = arith.addf %119, %131 : vector<16x70xf32>
    %c19_70 = arith.constant 19 : index
    %c0_71 = arith.constant 0 : index
    %133 = vector.load %arg1[%c19_70, %c0_71] : memref<48x70xf32, #tpu.memory_space<vmem>>, vector<1x70xf32>
    %134 = vector.broadcast %133 : vector<1x70xf32> to vector<16x70xf32>
    %135 = arith.mulf %134, %128 : vector<16x70xf32>
    %136 = arith.addf %123, %135 : vector<16x70xf32>
    %c20 = arith.constant 20 : index
    %c0_72 = arith.constant 0 : index
    %137 = vector.load %arg1[%c20, %c0_72] : memref<48x70xf32, #tpu.memory_space<vmem>>, vector<1x70xf32>
    %138 = vector.broadcast %137 : vector<1x70xf32> to vector<16x70xf32>
    %139 = arith.mulf %138, %128 : vector<16x70xf32>
    %140 = arith.addf %127, %139 : vector<16x70xf32>
    %c0_73 = arith.constant 0 : index
    %c1_74 = arith.constant 1 : index
    %141 = vector.load %arg5[%c0_73, %c1_74] : memref<18x72xf32, #tpu.memory_space<vmem>>, vector<16x70xf32>
    %c21 = arith.constant 21 : index
    %c0_75 = arith.constant 0 : index
    %142 = vector.load %arg1[%c21, %c0_75] : memref<48x70xf32, #tpu.memory_space<vmem>>, vector<1x70xf32>
    %143 = vector.broadcast %142 : vector<1x70xf32> to vector<16x70xf32>
    %144 = arith.mulf %143, %141 : vector<16x70xf32>
    %145 = arith.addf %132, %144 : vector<16x70xf32>
    %c22 = arith.constant 22 : index
    %c0_76 = arith.constant 0 : index
    %146 = vector.load %arg1[%c22, %c0_76] : memref<48x70xf32, #tpu.memory_space<vmem>>, vector<1x70xf32>
    %147 = vector.broadcast %146 : vector<1x70xf32> to vector<16x70xf32>
    %148 = arith.mulf %147, %141 : vector<16x70xf32>
    %149 = arith.addf %136, %148 : vector<16x70xf32>
    %c23 = arith.constant 23 : index
    %c0_77 = arith.constant 0 : index
    %150 = vector.load %arg1[%c23, %c0_77] : memref<48x70xf32, #tpu.memory_space<vmem>>, vector<1x70xf32>
    %151 = vector.broadcast %150 : vector<1x70xf32> to vector<16x70xf32>
    %152 = arith.mulf %151, %141 : vector<16x70xf32>
    %153 = arith.addf %140, %152 : vector<16x70xf32>
    %154 = vector.extract_strided_slice %145 {offsets = [0, 0], sizes = [16, 16], strides = [1, 1]} : vector<16x70xf32> to vector<16x16xf32>
    %155 = vector.extract_strided_slice %145 {offsets = [0, 18], sizes = [16, 16], strides = [1, 1]} : vector<16x70xf32> to vector<16x16xf32>
    %156 = arith.addf %154, %155 : vector<16x16xf32>
    %157 = vector.extract_strided_slice %145 {offsets = [0, 36], sizes = [16, 16], strides = [1, 1]} : vector<16x70xf32> to vector<16x16xf32>
    %158 = arith.addf %156, %157 : vector<16x16xf32>
    %159 = vector.extract_strided_slice %145 {offsets = [0, 54], sizes = [16, 16], strides = [1, 1]} : vector<16x70xf32> to vector<16x16xf32>
    %160 = arith.addf %158, %159 : vector<16x16xf32>
    %c0_78 = arith.constant 0 : index
    %c0_79 = arith.constant 0 : index
    %c48 = arith.constant 48 : index
    %161 = vector.load %arg4[%c0_78, %c0_79, %c48] : memref<1x16x192xf32, #tpu.memory_space<vmem>>, vector<1x16x16xf32>
    %162 = vector.shape_cast %161 : vector<1x16x16xf32> to vector<16x16xf32>
    %163 = vector.shape_cast %160 : vector<16x16xf32> to vector<1x16x16xf32>
    tpu.vector_store %arg4[%c0_78, %c0_79, %c48], %163 {strides = array<i32>} : memref<1x16x192xf32, #tpu.memory_space<vmem>>, vector<1x16x16xf32>,
    %164 = vector.extract_strided_slice %149 {offsets = [0, 0], sizes = [16, 16], strides = [1, 1]} : vector<16x70xf32> to vector<16x16xf32>
    %165 = vector.extract_strided_slice %149 {offsets = [0, 18], sizes = [16, 16], strides = [1, 1]} : vector<16x70xf32> to vector<16x16xf32>
    %166 = arith.addf %164, %165 : vector<16x16xf32>
    %167 = vector.extract_strided_slice %149 {offsets = [0, 36], sizes = [16, 16], strides = [1, 1]} : vector<16x70xf32> to vector<16x16xf32>
    %168 = arith.addf %166, %167 : vector<16x16xf32>
    %169 = vector.extract_strided_slice %149 {offsets = [0, 54], sizes = [16, 16], strides = [1, 1]} : vector<16x70xf32> to vector<16x16xf32>
    %170 = arith.addf %168, %169 : vector<16x16xf32>
    %c0_80 = arith.constant 0 : index
    %c0_81 = arith.constant 0 : index
    %c64 = arith.constant 64 : index
    %171 = vector.load %arg4[%c0_80, %c0_81, %c64] : memref<1x16x192xf32, #tpu.memory_space<vmem>>, vector<1x16x16xf32>
    %172 = vector.shape_cast %171 : vector<1x16x16xf32> to vector<16x16xf32>
    %173 = vector.shape_cast %170 : vector<16x16xf32> to vector<1x16x16xf32>
    tpu.vector_store %arg4[%c0_80, %c0_81, %c64], %173 {strides = array<i32>} : memref<1x16x192xf32, #tpu.memory_space<vmem>>, vector<1x16x16xf32>,
    %174 = vector.extract_strided_slice %153 {offsets = [0, 0], sizes = [16, 16], strides = [1, 1]} : vector<16x70xf32> to vector<16x16xf32>
    %175 = vector.extract_strided_slice %153 {offsets = [0, 18], sizes = [16, 16], strides = [1, 1]} : vector<16x70xf32> to vector<16x16xf32>
    %176 = arith.addf %174, %175 : vector<16x16xf32>
    %177 = vector.extract_strided_slice %153 {offsets = [0, 36], sizes = [16, 16], strides = [1, 1]} : vector<16x70xf32> to vector<16x16xf32>
    %178 = arith.addf %176, %177 : vector<16x16xf32>
    %179 = vector.extract_strided_slice %153 {offsets = [0, 54], sizes = [16, 16], strides = [1, 1]} : vector<16x70xf32> to vector<16x16xf32>
    %180 = arith.addf %178, %179 : vector<16x16xf32>
    %c0_82 = arith.constant 0 : index
    %c0_83 = arith.constant 0 : index
    %c80 = arith.constant 80 : index
    %181 = vector.load %arg4[%c0_82, %c0_83, %c80] : memref<1x16x192xf32, #tpu.memory_space<vmem>>, vector<1x16x16xf32>
    %182 = vector.shape_cast %181 : vector<1x16x16xf32> to vector<16x16xf32>
    %183 = vector.shape_cast %180 : vector<16x16xf32> to vector<1x16x16xf32>
    tpu.vector_store %arg4[%c0_82, %c0_83, %c80], %183 {strides = array<i32>} : memref<1x16x192xf32, #tpu.memory_space<vmem>>, vector<1x16x16xf32>,
    %cst_84 = arith.constant 0.000000e+00 : f32
    %184 = vector.broadcast %cst_84 : f32 to vector<16x70xf32>
    %cst_85 = arith.constant 0.000000e+00 : f32
    %185 = vector.broadcast %cst_85 : f32 to vector<16x70xf32>
    %cst_86 = arith.constant 0.000000e+00 : f32
    %186 = vector.broadcast %cst_86 : f32 to vector<16x70xf32>
    %c2_87 = arith.constant 2 : index
    %c1_88 = arith.constant 1 : index
    %187 = vector.load %arg5[%c2_87, %c1_88] : memref<18x72xf32, #tpu.memory_space<vmem>>, vector<16x70xf32>
    %c24 = arith.constant 24 : index
    %c0_89 = arith.constant 0 : index
    %188 = vector.load %arg1[%c24, %c0_89] : memref<48x70xf32, #tpu.memory_space<vmem>>, vector<1x70xf32>
    %189 = vector.broadcast %188 : vector<1x70xf32> to vector<16x70xf32>
    %190 = arith.mulf %189, %187 : vector<16x70xf32>
    %191 = arith.addf %184, %190 : vector<16x70xf32>
    %c25 = arith.constant 25 : index
    %c0_90 = arith.constant 0 : index
    %192 = vector.load %arg1[%c25, %c0_90] : memref<48x70xf32, #tpu.memory_space<vmem>>, vector<1x70xf32>
    %193 = vector.broadcast %192 : vector<1x70xf32> to vector<16x70xf32>
    %194 = arith.mulf %193, %187 : vector<16x70xf32>
    %195 = arith.addf %185, %194 : vector<16x70xf32>
    %c26 = arith.constant 26 : index
    %c0_91 = arith.constant 0 : index
    %196 = vector.load %arg1[%c26, %c0_91] : memref<48x70xf32, #tpu.memory_space<vmem>>, vector<1x70xf32>
    %197 = vector.broadcast %196 : vector<1x70xf32> to vector<16x70xf32>
    %198 = arith.mulf %197, %187 : vector<16x70xf32>
    %199 = arith.addf %186, %198 : vector<16x70xf32>
    %c2_92 = arith.constant 2 : index
    %c0_93 = arith.constant 0 : index
    %200 = vector.load %arg5[%c2_92, %c0_93] : memref<18x72xf32, #tpu.memory_space<vmem>>, vector<16x70xf32>
    %c27 = arith.constant 27 : index
    %c0_94 = arith.constant 0 : index
    %201 = vector.load %arg1[%c27, %c0_94] : memref<48x70xf32, #tpu.memory_space<vmem>>, vector<1x70xf32>
    %202 = vector.broadcast %201 : vector<1x70xf32> to vector<16x70xf32>
    %203 = arith.mulf %202, %200 : vector<16x70xf32>
    %204 = arith.addf %191, %203 : vector<16x70xf32>
    %c28 = arith.constant 28 : index
    %c0_95 = arith.constant 0 : index
    %205 = vector.load %arg1[%c28, %c0_95] : memref<48x70xf32, #tpu.memory_space<vmem>>, vector<1x70xf32>
    %206 = vector.broadcast %205 : vector<1x70xf32> to vector<16x70xf32>
    %207 = arith.mulf %206, %200 : vector<16x70xf32>
    %208 = arith.addf %195, %207 : vector<16x70xf32>
    %c29 = arith.constant 29 : index
    %c0_96 = arith.constant 0 : index
    %209 = vector.load %arg1[%c29, %c0_96] : memref<48x70xf32, #tpu.memory_space<vmem>>, vector<1x70xf32>
    %210 = vector.broadcast %209 : vector<1x70xf32> to vector<16x70xf32>
    %211 = arith.mulf %210, %200 : vector<16x70xf32>
    %212 = arith.addf %199, %211 : vector<16x70xf32>
    %c1_97 = arith.constant 1 : index
    %c1_98 = arith.constant 1 : index
    %213 = vector.load %arg5[%c1_97, %c1_98] : memref<18x72xf32, #tpu.memory_space<vmem>>, vector<16x70xf32>
    %c30 = arith.constant 30 : index
    %c0_99 = arith.constant 0 : index
    %214 = vector.load %arg1[%c30, %c0_99] : memref<48x70xf32, #tpu.memory_space<vmem>>, vector<1x70xf32>
    %215 = vector.broadcast %214 : vector<1x70xf32> to vector<16x70xf32>
    %216 = arith.mulf %215, %213 : vector<16x70xf32>
    %217 = arith.addf %204, %216 : vector<16x70xf32>
    %c31 = arith.constant 31 : index
    %c0_100 = arith.constant 0 : index
    %218 = vector.load %arg1[%c31, %c0_100] : memref<48x70xf32, #tpu.memory_space<vmem>>, vector<1x70xf32>
    %219 = vector.broadcast %218 : vector<1x70xf32> to vector<16x70xf32>
    %220 = arith.mulf %219, %213 : vector<16x70xf32>
    %221 = arith.addf %208, %220 : vector<16x70xf32>
    %c32_101 = arith.constant 32 : index
    %c0_102 = arith.constant 0 : index
    %222 = vector.load %arg1[%c32_101, %c0_102] : memref<48x70xf32, #tpu.memory_space<vmem>>, vector<1x70xf32>
    %223 = vector.broadcast %222 : vector<1x70xf32> to vector<16x70xf32>
    %224 = arith.mulf %223, %213 : vector<16x70xf32>
    %225 = arith.addf %212, %224 : vector<16x70xf32>
    %c1_103 = arith.constant 1 : index
    %c0_104 = arith.constant 0 : index
    %226 = vector.load %arg5[%c1_103, %c0_104] : memref<18x72xf32, #tpu.memory_space<vmem>>, vector<16x70xf32>
    %c33 = arith.constant 33 : index
    %c0_105 = arith.constant 0 : index
    %227 = vector.load %arg1[%c33, %c0_105] : memref<48x70xf32, #tpu.memory_space<vmem>>, vector<1x70xf32>
    %228 = vector.broadcast %227 : vector<1x70xf32> to vector<16x70xf32>
    %229 = arith.mulf %228, %226 : vector<16x70xf32>
    %230 = arith.addf %217, %229 : vector<16x70xf32>
    %c34 = arith.constant 34 : index
    %c0_106 = arith.constant 0 : index
    %231 = vector.load %arg1[%c34, %c0_106] : memref<48x70xf32, #tpu.memory_space<vmem>>, vector<1x70xf32>
    %232 = vector.broadcast %231 : vector<1x70xf32> to vector<16x70xf32>
    %233 = arith.mulf %232, %226 : vector<16x70xf32>
    %234 = arith.addf %221, %233 : vector<16x70xf32>
    %c35 = arith.constant 35 : index
    %c0_107 = arith.constant 0 : index
    %235 = vector.load %arg1[%c35, %c0_107] : memref<48x70xf32, #tpu.memory_space<vmem>>, vector<1x70xf32>
    %236 = vector.broadcast %235 : vector<1x70xf32> to vector<16x70xf32>
    %237 = arith.mulf %236, %226 : vector<16x70xf32>
    %238 = arith.addf %225, %237 : vector<16x70xf32>
    %239 = vector.extract_strided_slice %230 {offsets = [0, 0], sizes = [16, 16], strides = [1, 1]} : vector<16x70xf32> to vector<16x16xf32>
    %240 = vector.extract_strided_slice %230 {offsets = [0, 18], sizes = [16, 16], strides = [1, 1]} : vector<16x70xf32> to vector<16x16xf32>
    %241 = arith.addf %239, %240 : vector<16x16xf32>
    %242 = vector.extract_strided_slice %230 {offsets = [0, 36], sizes = [16, 16], strides = [1, 1]} : vector<16x70xf32> to vector<16x16xf32>
    %243 = arith.addf %241, %242 : vector<16x16xf32>
    %244 = vector.extract_strided_slice %230 {offsets = [0, 54], sizes = [16, 16], strides = [1, 1]} : vector<16x70xf32> to vector<16x16xf32>
    %245 = arith.addf %243, %244 : vector<16x16xf32>
    %c0_108 = arith.constant 0 : index
    %c0_109 = arith.constant 0 : index
    %c96 = arith.constant 96 : index
    %246 = vector.load %arg4[%c0_108, %c0_109, %c96] : memref<1x16x192xf32, #tpu.memory_space<vmem>>, vector<1x16x16xf32>
    %247 = vector.shape_cast %246 : vector<1x16x16xf32> to vector<16x16xf32>
    %248 = vector.shape_cast %245 : vector<16x16xf32> to vector<1x16x16xf32>
    tpu.vector_store %arg4[%c0_108, %c0_109, %c96], %248 {strides = array<i32>} : memref<1x16x192xf32, #tpu.memory_space<vmem>>, vector<1x16x16xf32>,
    %249 = vector.extract_strided_slice %234 {offsets = [0, 0], sizes = [16, 16], strides = [1, 1]} : vector<16x70xf32> to vector<16x16xf32>
    %250 = vector.extract_strided_slice %234 {offsets = [0, 18], sizes = [16, 16], strides = [1, 1]} : vector<16x70xf32> to vector<16x16xf32>
    %251 = arith.addf %249, %250 : vector<16x16xf32>
    %252 = vector.extract_strided_slice %234 {offsets = [0, 36], sizes = [16, 16], strides = [1, 1]} : vector<16x70xf32> to vector<16x16xf32>
    %253 = arith.addf %251, %252 : vector<16x16xf32>
    %254 = vector.extract_strided_slice %234 {offsets = [0, 54], sizes = [16, 16], strides = [1, 1]} : vector<16x70xf32> to vector<16x16xf32>
    %255 = arith.addf %253, %254 : vector<16x16xf32>
    %c0_110 = arith.constant 0 : index
    %c0_111 = arith.constant 0 : index
    %c112 = arith.constant 112 : index
    %256 = vector.load %arg4[%c0_110, %c0_111, %c112] : memref<1x16x192xf32, #tpu.memory_space<vmem>>, vector<1x16x16xf32>
    %257 = vector.shape_cast %256 : vector<1x16x16xf32> to vector<16x16xf32>
    %258 = vector.shape_cast %255 : vector<16x16xf32> to vector<1x16x16xf32>
    tpu.vector_store %arg4[%c0_110, %c0_111, %c112], %258 {strides = array<i32>} : memref<1x16x192xf32, #tpu.memory_space<vmem>>, vector<1x16x16xf32>,
    %259 = vector.extract_strided_slice %238 {offsets = [0, 0], sizes = [16, 16], strides = [1, 1]} : vector<16x70xf32> to vector<16x16xf32>
    %260 = vector.extract_strided_slice %238 {offsets = [0, 18], sizes = [16, 16], strides = [1, 1]} : vector<16x70xf32> to vector<16x16xf32>
    %261 = arith.addf %259, %260 : vector<16x16xf32>
    %262 = vector.extract_strided_slice %238 {offsets = [0, 36], sizes = [16, 16], strides = [1, 1]} : vector<16x70xf32> to vector<16x16xf32>
    %263 = arith.addf %261, %262 : vector<16x16xf32>
    %264 = vector.extract_strided_slice %238 {offsets = [0, 54], sizes = [16, 16], strides = [1, 1]} : vector<16x70xf32> to vector<16x16xf32>
    %265 = arith.addf %263, %264 : vector<16x16xf32>
    %c0_112 = arith.constant 0 : index
    %c0_113 = arith.constant 0 : index
    %c128 = arith.constant 128 : index
    %266 = vector.load %arg4[%c0_112, %c0_113, %c128] : memref<1x16x192xf32, #tpu.memory_space<vmem>>, vector<1x16x16xf32>
    %267 = vector.shape_cast %266 : vector<1x16x16xf32> to vector<16x16xf32>
    %268 = vector.shape_cast %265 : vector<16x16xf32> to vector<1x16x16xf32>
    tpu.vector_store %arg4[%c0_112, %c0_113, %c128], %268 {strides = array<i32>} : memref<1x16x192xf32, #tpu.memory_space<vmem>>, vector<1x16x16xf32>,
    %cst_114 = arith.constant 0.000000e+00 : f32
    %269 = vector.broadcast %cst_114 : f32 to vector<16x70xf32>
    %cst_115 = arith.constant 0.000000e+00 : f32
    %270 = vector.broadcast %cst_115 : f32 to vector<16x70xf32>
    %cst_116 = arith.constant 0.000000e+00 : f32
    %271 = vector.broadcast %cst_116 : f32 to vector<16x70xf32>
    %c2_117 = arith.constant 2 : index
    %c2_118 = arith.constant 2 : index
    %272 = vector.load %arg5[%c2_117, %c2_118] : memref<18x72xf32, #tpu.memory_space<vmem>>, vector<16x70xf32>
    %c36 = arith.constant 36 : index
    %c0_119 = arith.constant 0 : index
    %273 = vector.load %arg1[%c36, %c0_119] : memref<48x70xf32, #tpu.memory_space<vmem>>, vector<1x70xf32>
    %274 = vector.broadcast %273 : vector<1x70xf32> to vector<16x70xf32>
    %275 = arith.mulf %274, %272 : vector<16x70xf32>
    %276 = arith.addf %269, %275 : vector<16x70xf32>
    %c37_120 = arith.constant 37 : index
    %c0_121 = arith.constant 0 : index
    %277 = vector.load %arg1[%c37_120, %c0_121] : memref<48x70xf32, #tpu.memory_space<vmem>>, vector<1x70xf32>
    %278 = vector.broadcast %277 : vector<1x70xf32> to vector<16x70xf32>
    %279 = arith.mulf %278, %272 : vector<16x70xf32>
    %280 = arith.addf %270, %279 : vector<16x70xf32>
    %c38 = arith.constant 38 : index
    %c0_122 = arith.constant 0 : index
    %281 = vector.load %arg1[%c38, %c0_122] : memref<48x70xf32, #tpu.memory_space<vmem>>, vector<1x70xf32>
    %282 = vector.broadcast %281 : vector<1x70xf32> to vector<16x70xf32>
    %283 = arith.mulf %282, %272 : vector<16x70xf32>
    %284 = arith.addf %271, %283 : vector<16x70xf32>
    %c2_123 = arith.constant 2 : index
    %c1_124 = arith.constant 1 : index
    %285 = vector.load %arg5[%c2_123, %c1_124] : memref<18x72xf32, #tpu.memory_space<vmem>>, vector<16x70xf32>
    %c39 = arith.constant 39 : index
    %c0_125 = arith.constant 0 : index
    %286 = vector.load %arg1[%c39, %c0_125] : memref<48x70xf32, #tpu.memory_space<vmem>>, vector<1x70xf32>
    %287 = vector.broadcast %286 : vector<1x70xf32> to vector<16x70xf32>
    %288 = arith.mulf %287, %285 : vector<16x70xf32>
    %289 = arith.addf %276, %288 : vector<16x70xf32>
    %c40 = arith.constant 40 : index
    %c0_126 = arith.constant 0 : index
    %290 = vector.load %arg1[%c40, %c0_126] : memref<48x70xf32, #tpu.memory_space<vmem>>, vector<1x70xf32>
    %291 = vector.broadcast %290 : vector<1x70xf32> to vector<16x70xf32>
    %292 = arith.mulf %291, %285 : vector<16x70xf32>
    %293 = arith.addf %280, %292 : vector<16x70xf32>
    %c41 = arith.constant 41 : index
    %c0_127 = arith.constant 0 : index
    %294 = vector.load %arg1[%c41, %c0_127] : memref<48x70xf32, #tpu.memory_space<vmem>>, vector<1x70xf32>
    %295 = vector.broadcast %294 : vector<1x70xf32> to vector<16x70xf32>
    %296 = arith.mulf %295, %285 : vector<16x70xf32>
    %297 = arith.addf %284, %296 : vector<16x70xf32>
    %c1_128 = arith.constant 1 : index
    %c2_129 = arith.constant 2 : index
    %298 = vector.load %arg5[%c1_128, %c2_129] : memref<18x72xf32, #tpu.memory_space<vmem>>, vector<16x70xf32>
    %c42 = arith.constant 42 : index
    %c0_130 = arith.constant 0 : index
    %299 = vector.load %arg1[%c42, %c0_130] : memref<48x70xf32, #tpu.memory_space<vmem>>, vector<1x70xf32>
    %300 = vector.broadcast %299 : vector<1x70xf32> to vector<16x70xf32>
    %301 = arith.mulf %300, %298 : vector<16x70xf32>
    %302 = arith.addf %289, %301 : vector<16x70xf32>
    %c43 = arith.constant 43 : index
    %c0_131 = arith.constant 0 : index
    %303 = vector.load %arg1[%c43, %c0_131] : memref<48x70xf32, #tpu.memory_space<vmem>>, vector<1x70xf32>
    %304 = vector.broadcast %303 : vector<1x70xf32> to vector<16x70xf32>
    %305 = arith.mulf %304, %298 : vector<16x70xf32>
    %306 = arith.addf %293, %305 : vector<16x70xf32>
    %c44 = arith.constant 44 : index
    %c0_132 = arith.constant 0 : index
    %307 = vector.load %arg1[%c44, %c0_132] : memref<48x70xf32, #tpu.memory_space<vmem>>, vector<1x70xf32>
    %308 = vector.broadcast %307 : vector<1x70xf32> to vector<16x70xf32>
    %309 = arith.mulf %308, %298 : vector<16x70xf32>
    %310 = arith.addf %297, %309 : vector<16x70xf32>
    %c1_133 = arith.constant 1 : index
    %c1_134 = arith.constant 1 : index
    %311 = vector.load %arg5[%c1_133, %c1_134] : memref<18x72xf32, #tpu.memory_space<vmem>>, vector<16x70xf32>
    %c45 = arith.constant 45 : index
    %c0_135 = arith.constant 0 : index
    %312 = vector.load %arg1[%c45, %c0_135] : memref<48x70xf32, #tpu.memory_space<vmem>>, vector<1x70xf32>
    %313 = vector.broadcast %312 : vector<1x70xf32> to vector<16x70xf32>
    %314 = arith.mulf %313, %311 : vector<16x70xf32>
    %315 = arith.addf %302, %314 : vector<16x70xf32>
    %c46 = arith.constant 46 : index
    %c0_136 = arith.constant 0 : index
    %316 = vector.load %arg1[%c46, %c0_136] : memref<48x70xf32, #tpu.memory_space<vmem>>, vector<1x70xf32>
    %317 = vector.broadcast %316 : vector<1x70xf32> to vector<16x70xf32>
    %318 = arith.mulf %317, %311 : vector<16x70xf32>
    %319 = arith.addf %306, %318 : vector<16x70xf32>
    %c47 = arith.constant 47 : index
    %c0_137 = arith.constant 0 : index
    %320 = vector.load %arg1[%c47, %c0_137] : memref<48x70xf32, #tpu.memory_space<vmem>>, vector<1x70xf32>
    %321 = vector.broadcast %320 : vector<1x70xf32> to vector<16x70xf32>
    %322 = arith.mulf %321, %311 : vector<16x70xf32>
    %323 = arith.addf %310, %322 : vector<16x70xf32>
    %324 = vector.extract_strided_slice %315 {offsets = [0, 0], sizes = [16, 16], strides = [1, 1]} : vector<16x70xf32> to vector<16x16xf32>
    %325 = vector.extract_strided_slice %315 {offsets = [0, 18], sizes = [16, 16], strides = [1, 1]} : vector<16x70xf32> to vector<16x16xf32>
    %326 = arith.addf %324, %325 : vector<16x16xf32>
    %327 = vector.extract_strided_slice %315 {offsets = [0, 36], sizes = [16, 16], strides = [1, 1]} : vector<16x70xf32> to vector<16x16xf32>
    %328 = arith.addf %326, %327 : vector<16x16xf32>
    %329 = vector.extract_strided_slice %315 {offsets = [0, 54], sizes = [16, 16], strides = [1, 1]} : vector<16x70xf32> to vector<16x16xf32>
    %330 = arith.addf %328, %329 : vector<16x16xf32>
    %c0_138 = arith.constant 0 : index
    %c0_139 = arith.constant 0 : index
    %c144 = arith.constant 144 : index
    %331 = vector.load %arg4[%c0_138, %c0_139, %c144] : memref<1x16x192xf32, #tpu.memory_space<vmem>>, vector<1x16x16xf32>
    %332 = vector.shape_cast %331 : vector<1x16x16xf32> to vector<16x16xf32>
    %333 = vector.shape_cast %330 : vector<16x16xf32> to vector<1x16x16xf32>
    tpu.vector_store %arg4[%c0_138, %c0_139, %c144], %333 {strides = array<i32>} : memref<1x16x192xf32, #tpu.memory_space<vmem>>, vector<1x16x16xf32>,
    %334 = vector.extract_strided_slice %319 {offsets = [0, 0], sizes = [16, 16], strides = [1, 1]} : vector<16x70xf32> to vector<16x16xf32>
    %335 = vector.extract_strided_slice %319 {offsets = [0, 18], sizes = [16, 16], strides = [1, 1]} : vector<16x70xf32> to vector<16x16xf32>
    %336 = arith.addf %334, %335 : vector<16x16xf32>
    %337 = vector.extract_strided_slice %319 {offsets = [0, 36], sizes = [16, 16], strides = [1, 1]} : vector<16x70xf32> to vector<16x16xf32>
    %338 = arith.addf %336, %337 : vector<16x16xf32>
    %339 = vector.extract_strided_slice %319 {offsets = [0, 54], sizes = [16, 16], strides = [1, 1]} : vector<16x70xf32> to vector<16x16xf32>
    %340 = arith.addf %338, %339 : vector<16x16xf32>
    %c0_140 = arith.constant 0 : index
    %c0_141 = arith.constant 0 : index
    %c160 = arith.constant 160 : index
    %341 = vector.load %arg4[%c0_140, %c0_141, %c160] : memref<1x16x192xf32, #tpu.memory_space<vmem>>, vector<1x16x16xf32>
    %342 = vector.shape_cast %341 : vector<1x16x16xf32> to vector<16x16xf32>
    %343 = vector.shape_cast %340 : vector<16x16xf32> to vector<1x16x16xf32>
    tpu.vector_store %arg4[%c0_140, %c0_141, %c160], %343 {strides = array<i32>} : memref<1x16x192xf32, #tpu.memory_space<vmem>>, vector<1x16x16xf32>,
    %344 = vector.extract_strided_slice %323 {offsets = [0, 0], sizes = [16, 16], strides = [1, 1]} : vector<16x70xf32> to vector<16x16xf32>
    %345 = vector.extract_strided_slice %323 {offsets = [0, 18], sizes = [16, 16], strides = [1, 1]} : vector<16x70xf32> to vector<16x16xf32>
    %346 = arith.addf %344, %345 : vector<16x16xf32>
    %347 = vector.extract_strided_slice %323 {offsets = [0, 36], sizes = [16, 16], strides = [1, 1]} : vector<16x70xf32> to vector<16x16xf32>
    %348 = arith.addf %346, %347 : vector<16x16xf32>
    %349 = vector.extract_strided_slice %323 {offsets = [0, 54], sizes = [16, 16], strides = [1, 1]} : vector<16x70xf32> to vector<16x16xf32>
    %350 = arith.addf %348, %349 : vector<16x16xf32>
    %c0_142 = arith.constant 0 : index
    %c0_143 = arith.constant 0 : index
    %c176 = arith.constant 176 : index
    %351 = vector.load %arg4[%c0_142, %c0_143, %c176] : memref<1x16x192xf32, #tpu.memory_space<vmem>>, vector<1x16x16xf32>
    %352 = vector.shape_cast %351 : vector<1x16x16xf32> to vector<16x16xf32>
    %353 = vector.shape_cast %350 : vector<16x16xf32> to vector<1x16x16xf32>
    tpu.vector_store %arg4[%c0_142, %c0_143, %c176], %353 {strides = array<i32>} : memref<1x16x192xf32, #tpu.memory_space<vmem>>, vector<1x16x16xf32>,
    %c0_144 = arith.constant 0 : index
    %c0_145 = arith.constant 0 : index
    %c0_146 = arith.constant 0 : index
    %354 = vector.load %arg4[%c0_144, %c0_145, %c0_146] : memref<1x16x192xf32, #tpu.memory_space<vmem>>, vector<1x16x192xf32>
    %355 = vector.shape_cast %354 : vector<1x16x192xf32> to vector<16x192xf32>
    %c0_147 = arith.constant 0 : index
    %c0_148 = arith.constant 0 : index
    %356 = vector.load %arg2[%c0_147, %c0_148] : memref<1x192xf32, #tpu.memory_space<vmem>>, vector<1x192xf32>
    %357 = vector.broadcast %356 : vector<1x192xf32> to vector<16x192xf32>
    %358 = arith.addf %355, %357 : vector<16x192xf32>
    %359 = math.tanh %358 : vector<16x192xf32>
    %c0_149 = arith.constant 0 : index
    %c0_150 = arith.constant 0 : index
    %c0_151 = arith.constant 0 : index
    %360 = vector.load %arg4[%c0_149, %c0_150, %c0_151] : memref<1x16x192xf32, #tpu.memory_space<vmem>>, vector<1x16x192xf32>
    %361 = vector.shape_cast %360 : vector<1x16x192xf32> to vector<16x192xf32>
    %362 = vector.shape_cast %359 : vector<16x192xf32> to vector<1x16x192xf32>
    tpu.vector_store %arg4[%c0_149, %c0_150, %c0_151], %362 {strides = array<i32>} : memref<1x16x192xf32, #tpu.memory_space<vmem>>, vector<1x16x192xf32>,
    return
  }
  func.func @transform_0(%arg0: i32) -> (i32, i32) {
    %c0_i32 = arith.constant 0 : i32
    %c0_i32_0 = arith.constant 0 : i32
    %c0_i32_1 = arith.constant 0 : i32
    return %c0_i32, %c0_i32_0 : i32, i32
  }
  func.func @transform_1(%arg0: i32) -> (i32, i32) {
    %c0_i32 = arith.constant 0 : i32
    %c0_i32_0 = arith.constant 0 : i32
    %c0_i32_1 = arith.constant 0 : i32
    return %c0_i32, %c0_i32_0 : i32, i32
  }
  func.func @transform_2(%arg0: i32) -> (i32, i32, i32, i32) {
    %c0_i32 = arith.constant 0 : i32
    %c0_i32_0 = arith.constant 0 : i32
    %c0_i32_1 = arith.constant 0 : i32
    %c0_i32_2 = arith.constant 0 : i32
    return %arg0, %c0_i32, %c0_i32_0, %c0_i32_1 : i32, i32, i32, i32
  }
  func.func @transform_3(%arg0: i32) -> (i32, i32, i32) {
    %c0_i32 = arith.constant 0 : i32
    %c0_i32_0 = arith.constant 0 : i32
    %c0_i32_1 = arith.constant 0 : i32
    return %arg0, %c0_i32, %c0_i32_0 : i32, i32, i32
  }
}

</mosaic_0001>

<bundles_post_ra>
// kernel: _lambda_.1
= control target key start
LH: loop header
LB: loop body
LE: loop exit
PB: predicated region body
PF: predicated region fallthrough
CT: control target
= control target key end

     0   :  { %8 = vsyncpa [#allocation4], 0  ;;  %s2315_s0 = inlined_call_operand.hbm [shape: f32[48,70], index: 0, kind: input, shape index: {}]   ;;  %s2316_s1 = inlined_call_operand.hbm [shape: f32[1,192], index: 1, kind: input, shape index: {}]   ;;  %s2317_s2 = inlined_call_operand.hbm [shape: f32[2,4,16,16], index: 2, kind: input, shape index: {}]   ;;  %s2318_s3 = inlined_call_operand.vmem [shape: f32[2,16,192], index: 3, kind: output, shape index: {}]  }
   0x1   :  { %9 = vsyncpa [#allocation6], 0  ;;  %s1682_s12 = smov 0   ;;  %s1684_s13 = smov 0  }
   0x2   :  { %s1686_s14 = smov 0   ;;  %s1688_s15 = smov 0  }
   0x3 LB: > { %s1701_s16 = sadd.s32 4294967295, %s1638_s15   ;;  %s1704_s17 = sadd.s32 1, %s1638_s15   ;;  %s1638_s15 = sphi %s1688_s15, %s2343_s15   ;;  %s1634_s14 = sphi %s1686_s14, %s2342_s14   ;;  %s1630_s13 = sphi %s1684_s13, %s2341_s13   ;;  %s1626_s12 = sphi %s1682_s12, %s2340_s12  }
   0x4   : > { %s61_s18 = ssub.s32 %s1638_s15, %s1704_s17  ;;  %s64_s19 = sadd.s32 1, %s1634_s14 }
   0x5   : > { %p62_p0 = scmp.eq.s32.totalorder %s61_s18, 0  ;;  %p71_p1 = scmp.ne.s32.totalorder %s1634_s14, %s1630_s13 }
   0x6   : > { %p72_p2 = scmp.eq.s32.totalorder %s1638_s15, 0  ;;  %p77_p3 = scmp.ne.s32.totalorder %s1630_s13, %s1626_s12 }
   0x7   : > { %s1714_s20 = scalar_select %p62_p0, %s1634_s14, %s64_s19  }
   0x8   : > { %p73_p4 = por %p72_p2, %p71_p1  ;;  %p2319_p5 = scmp.eq.s32.totalorder %s1701_s16, 0 }
   0x9   : > { %p1352_p6 = scmp.ge.s32.totalorder %s1638_s15, 1  ;;  %p114_p7 = scmp.lt.s32.totalorder %s1638_s15, 3 }
   0xa   : > { %p1721_p8 = por %p2319_p5, %p77_p3  ;;  %s1640_s23 = smov [#allocation3]  }
   0xb   : > { %p1725_p9 = pnand %p1352_p6, %p114_p7  ;;  %s126_s24 = sshll.u32 %s1640_s23, 4  ;;  %s127_s24 = int_to_ptr.vmem [resolvable:$true] %s126_s24 }
   0xc   : > { %s2325_s21 = scalar_select %p1721_p8, 1, 0 }
   0xd   : > { %s2326_s22 = scalar_select %p1725_p9, 1, 0 }
   0xe   : > { %p1433_p10 = pneg %p1725_p9  ;;  %p1446_p12 = scmp.lt.s32.totalorder %s1638_s15, 2 }
   0xf   : > { %s1510_s29 = scalar_lea.hbm %s2315_s0, 768 }
  0x10   : > { %p1733_p11 = pnand %p1433_p10, %p2319_p5  ;;  %p1738_p13 = pnand %p1446_p12, %p73_p4 }
  0x11   : > { %p1511_p0 = scmp.ne.s32.totalorder %s2315_s0, %s1510_s29  ;;  %p1517_p4 = scmp.lt.u32.totalorder %s1510_s29, %s2315_s0 }
  0x12   : > { %s2328_s26 = scalar_select %p1738_p13, 1, 0 }
  0x13   : > { %p1512_p1 = pneg %p1733_p11 }
  0x15   : > { %p1513_p2 = pnand %p1512_p1, %p1511_p0 }
  0x17   : > { %p1514_p3 = pneg %p1513_p2 }
  0x19   : > { %p1519_p6 = pnand %p1517_p4, %p1514_p3 }
  0x1b   : > { %1522 = shalt.err (!%p1519_p6)
}
  0x1c   : > { %s1523_s7 = scalar_lea.vmem %s127_s24, 768  ;;  %p1531_p5 = scmp.lt.s32.totalorder %s127_s24, %s127_s24 }
  0x1d   : > { %p1524_p7 = scmp.ne.s32.totalorder %s127_s24, %s1523_s7  ;;  %p1532_p8 = scmp.lt.s32.totalorder %s1523_s7, %s1523_s7 }
  0x1f   : > { %p1526_p10 = pnand %p1524_p7, %p1512_p1  ;;  %p1533_p9 = por %p1532_p8, %p1531_p5 }
  0x21   : > { %p1527_p12 = pneg %p1526_p10 }
  0x23   : > { %p1534_p13 = pnand %p1533_p9, %p1527_p12 }
  0x25   : > { %1537 = shalt.err (!%p1534_p13)
}
  0x26   : > { %s1641_s8 = smov 128   ;;  %s1642_s9 = smov 8  }
  0x27   : > { %1436 = dma.hbm_to_vmem [thread:$0]  (!%p1733_p11), %s2315_s0, 768, %s127_s24, [#allocation4], %s1641_s8, %s1641_s8, %s1642_s9  }
  0x28   : > { %s1643_s12 = smov [#allocation5]   ;;  %s151_s19 = sand.u32 1, %s1638_s15  }
  0x29   : > { %s140_s18 = sshll.u32 %s1643_s12, 4  ;;  %s1538_s28 = scalar_lea.hbm %s2316_s1, 32  ;;  %s141_s18 = int_to_ptr.vmem [resolvable:$true] %s140_s18 }
  0x2a   : > { %p1539_p5 = scmp.ne.s32.totalorder %s2316_s1, %s1538_s28  ;;  %p1545_p13 = scmp.lt.u32.totalorder %s1538_s28, %s2316_s1 }
  0x2c   : > { %p1541_p8 = pnand %p1539_p5, %p1512_p1 }
  0x2e   : > { %p1542_p9 = pneg %p1541_p8 }
  0x30   : > { %p1547_p0 = pnand %p1545_p13, %p1542_p9 }
  0x32   : > { %1550 = shalt.err (!%p1547_p0)
}
  0x33   : > { %s1551_s24 = scalar_lea.vmem %s141_s18, 32  ;;  %p1559_p6 = scmp.lt.s32.totalorder %s141_s18, %s141_s18 }
  0x34   : > { %p1552_p2 = scmp.ne.s32.totalorder %s141_s18, %s1551_s24  ;;  %p1560_p7 = scmp.lt.s32.totalorder %s1551_s24, %s1551_s24 }
  0x36   : > { %p1554_p3 = pnand %p1552_p2, %p1512_p1  ;;  %p1561_p10 = por %p1560_p7, %p1559_p6 }
  0x38   : > { %p1555_p4 = pneg %p1554_p3 }
  0x3a   : > { %p1562_p12 = pnand %p1561_p10, %p1555_p4 }
  0x3c   : > { %1565 = shalt.err (!%p1562_p12)
}
  0x3d   : > { %1439 = dma.hbm_to_vmem [thread:$0]  (!%p1733_p11), %s2316_s1, 32, %s141_s18, [#allocation6]  }
  0x3e   : > { %s153_s10 = sand.u32 1, %s1634_s14   ;;  %s1421_s11 = sshll.u32 %s1638_s15, 10 }
  0x3f   : > { %s1356_s12 = sshll.u32 %s153_s10, 6  ;;  %s1793_s28 = scalar_lea.hbm %s2317_s2, %s1421_s11 }
  0x40   : > { %s155_s25 = scalar_lea.vmem [#allocation7], %s1356_s12  ;;  %s1797_s30 = scalar_lea.sflag [#allocation4], %s151_s19 }
  0x41   : > { %s162_s29 = sshll.u32 %s155_s25, 4  ;;  %s1566_s4 = scalar_lea.hbm %s1793_s28, 1024  ;;  %s1795_s29 = int_to_ptr.vmem [resolvable:$true] %s162_s29 }
  0x42   : > { %p1567_p11 = scmp.ne.s32.totalorder %s1793_s28, %s1566_s4  ;;  %p2329_p1 = scmp.ne.s32.totalorder %s2328_s26, 0 }
  0x43   : > { %s1571_s5 = scalar_lea.hbm %s2317_s2, 2048  ;;  %p1572_p13 = scmp.lt.u32.totalorder %s1793_s28, %s2317_s2 }
  0x44   : > { %p1568_p5 = pneg %p2329_p1  ;;  %p1573_p0 = scmp.lt.u32.totalorder %s1571_s5, %s1566_s4 }
  0x45   : > { %p1575_p3 = scmp.lt.u32.totalorder %s1566_s4, %s1793_s28 }
  0x46   : > { %p1569_p8 = pnand %p1568_p5, %p1567_p11  ;;  %p1574_p2 = por %p1573_p0, %p1572_p13 }
  0x48   : > { %p1570_p9 = pneg %p1569_p8  ;;  %p1576_p4 = por %p1575_p3, %p1574_p2 }
  0x4a   : > { %p1577_p6 = pnand %p1576_p4, %p1570_p9 }
  0x4c   : > { %1580 = shalt.err (!%p1577_p6)
}
  0x4d   : > { %s1581_s19 = scalar_lea.vmem %s1795_s29, 1024  ;;  %s1644_s7 = smov [#allocation7]  }
  0x4e   : > { %p1582_p7 = scmp.ne.s32.totalorder %s1795_s29, %s1581_s19  ;;  %s1586_s10 = sshll.u32 %s1644_s7, 4  ;;  %s1587_s10 = int_to_ptr.vmem [resolvable:$false] %s1586_s10 }
  0x4f   : > { %s1588_s11 = scalar_lea.vmem %s1587_s10, 2048  ;;  %p1589_p11 = scmp.lt.s32.totalorder %s1795_s29, %s1587_s10 }
  0x50   : > { %p1584_p10 = pnand %p1582_p7, %p1568_p5  ;;  %p1590_p8 = scmp.lt.s32.totalorder %s1588_s11, %s1581_s19 }
  0x52   : > { %p1585_p12 = pneg %p1584_p10  ;;  %p1591_p13 = por %p1590_p8, %p1589_p11 }
  0x54   : > { %p1592_p0 = pnand %p1591_p13, %p1585_p12 }
  0x56   : > { %1595 = shalt.err (!%p1592_p0)
}
  0x57   : > { %1443 = dma.hbm_to_vmem [thread:$0]  (!%p2329_p1), %s1793_s28, 1024, %s1795_s29, %s1797_s30, %s1641_s8, %s1641_s8, %s1642_s9  }
  0x58   : > { %p2330_p5 = scmp.ne.s32.totalorder %s2326_s22, 0 }
  0x5a   : > { %174 = sbr.rel (%p2330_p5) target bundleno = 754 (0x2f2), region = 32 }
  0x61   : > { %p2331_p9 = scmp.eq.s32.totalorder %s1701_s16, 0 }
  0x63   : > { %1613 = dma.done.wait (%p2331_p9), [#allocation4], 768   ;;  %p2332_p2 = pmov %p2331_p9 }
  0x65   : > { %1615 = vsyncadd (%p2332_p2), [#allocation4], 4294966528  ;;  %p2333_p3 = pmov %p2332_p2 }
  0x66   : > { %p2334_p4 = pmov %p2332_p2 }
  0x67   : > { %1617 = dma.done.wait (%p2333_p3), [#allocation6], 32  }
  0x68   : > { %1619 = vsyncadd (%p2334_p4), [#allocation6], 4294967264  ;;  %s184_s26 = sand.u32 1, %s1701_s16   ;;  %s186_s8 = sand.u32 1, %s1630_s13  }
  0x69   : > { %s1362_s9 = sshll.u32 %s186_s8, 6  ;;  %s185_s22 = scalar_lea.sflag [#allocation4], %s184_s26 }
  0x6a   : > { %s188_s12 = scalar_lea.vmem [#allocation7], %s1362_s9  ;;  %p2335_p1 = scmp.ne.s32.totalorder %s2325_s21, 0 }
  0x6c   : > { %1621 = dma.done.wait (%p2335_p1), %s185_s22, 1024  }
  0x6d   : > { %1623 = vsyncadd (%p2335_p1), %s185_s22, 4294966272  ;;  %vm216_vm0 = vcmask 588800   ;;  %v1645_v0 = vmov 0.0   ;;  %vm219_vm1 = vcmask 582656   ;;  %v1365_v1 = vld [vmem:[%s188_s12 + $0x10] sm:$0xff]  ;;  %v221_v2 = vld [vmem:[%s188_s12] sm:$0xff] }
  0x6e   : > { %217 = vst.msk [vmem:[#allocation2] sm:$0xff] %vm216_vm0, %v1645_v0  ;;  %218 = vst.msk [vmem:[#allocation2 + $0x8] sm:$0xff] %vm216_vm0, %v1645_v0  ;;  %s1646_s23 = smov 19   ;;  %s1647_s27 = smov 1   ;;  %v1366_v3 = vld [vmem:[%s188_s12 + $0x18] sm:$0xff]  ;;  %v222_v4 = vld [vmem:[%s188_s12 + $0x8] sm:$0xff] }
  0x6f   : > { %220 = vst.msk [vmem:[#allocation2 + $0x10] sm:$0x3] %vm219_vm1, %v1645_v0  ;;  %239 = vrot.lane.b32.xlu1 %v1365_v1, %s1646_s23  ;;  %225 = vrot.lane.b32.xlu0 %v221_v2, %s1647_s27  ;;  %v1368_v5 = vld [vmem:[%s188_s12 + $0x28] sm:$0xff]  ;;  %v1367_v6 = vld [vmem:[%s188_s12 + $0x20] sm:$0xff]  ;;  %s1648_s21 = smov 37   ;;  %s1649_s28 = smov 55  }
  0x70   : > { %v1370_v7 = vld [vmem:[%s188_s12 + $0x38] sm:$0xff]  ;;  %v1369_v8 = vld [vmem:[%s188_s12 + $0x30] sm:$0xff]  ;;  %vm231_vm2 = vcmask 138248   ;;  %vm245_vm3 = vcmask 285848   ;;  %vm259_vm4 = vcmask 433448   ;;  %vm273_vm5 = vcmask 581048  }
  0x71   : > { %s1650_s25 = smov 127   ;;  %s1651_s29 = smov 126   ;;  %v1374_v23 = vld [vmem:[#allocation3 + $0x3] ss:$0 sm:$0xff]  ;;  %v1375_v24 = vld [vmem:[#allocation3 + $0x4] ss:$0 sm:$0xff] }
  0x72   : > { %v1371_v25 = vld [vmem:[#allocation3] ss:$0 sm:$0xff]  ;;  %v1372_v26 = vld [vmem:[#allocation3 + $0x1] ss:$0 sm:$0xff]  ;;  %v1373_v27 = vld [vmem:[#allocation3 + $0x2] ss:$0 sm:$0xff] }
  0x73   : > { %241 = vrot.lane.b32.xlu1 %v1366_v3, %s1646_s23  ;;  %227 = vrot.lane.b32.xlu0 %v222_v4, %s1647_s27  ;;  %v1376_v28 = vld [vmem:[#allocation3 + $0x5] ss:$0 sm:$0xff]  ;;  %v1377_v41 = vld [vmem:[#allocation3 + $0x6] ss:$0 sm:$0xff]  ;;  %v1378_v42 = vld [vmem:[#allocation3 + $0x7] ss:$0 sm:$0xff] }
  0x74   : > { %v1379_v43 = vld [vmem:[#allocation3 + $0x8] ss:$0 sm:$0xff]  ;;  %v1380_v52 = vld [vmem:[#allocation3 + $0x9] ss:$0 sm:$0xff]  ;;  %v1381_v57 = vld [vmem:[#allocation3 + $0xa] ss:$0 sm:$0xff] }
  0x75   : > { %v1382_v58 = vld [vmem:[#allocation3 + $0xb] ss:$0 sm:$0xff]  ;;  %s1652_s30 = smov 110   ;;  %s1653_s4 = smov 92   ;;  %vm430_vm6 = vcmask 130048   ;;  %vm467_vm7 = vcmask 261248  }
  0x76   : > { %s1654_s15 = smov 74   ;;  %p211_p6 = scmp.lt.s32.totalorder %s1701_s16, 1  ;;  %vm504_vm8 = vcmask 392448   ;;  %vm681_vm9 = vcmask 523648   ;;  %vm718_vm10 = vcmask 654848   ;;  %vm755_vm11 = vcmask 786048  }
  0x77   : > { %255 = vrot.lane.b32.xlu1 %v1368_v5, %s1648_s21  ;;  %253 = vrot.lane.b32.xlu0 %v1367_v6, %s1648_s21  ;;  %s1656_s19 = smov 32   ;;  %s1657_s7 = smov 48   ;;  %vm920_vm12 = vcmask 917248   ;;  %vm957_vm13 = vcmask 1048448   ;;  %vm1261_vm14 = vcmask 523264  }
  0x78   : > { %s2345_s16 = smov (!%p211_p6, %s1701_s16), 1  ;;  %s1658_s10 = smov 64  }
  0x79   : > { %s1422_s18 = sshll.u32 %s2345_s16, 5  ;;  %s1655_s16 = smov 16  }
  0x7a   : > { %s2174_s6 = scalar_lea.vmem %s2318_s3, %s1422_s18  ;;  %s1659_s11 = smov 80  }
  0x7b   : > { %269 = vrot.lane.b32.xlu1 %v1370_v7, %s1649_s28  ;;  %267 = vrot.lane.b32.xlu0 %v1369_v8, %s1649_s28  ;;  %s1660_s26 = smov 96   ;;  %s1661_s8 = smov 112  }
  0xe1   : > { %v240_v9 = vpop.permute.xlu1 %239  ;;  %v226_v10 = vpop.permute.xlu0 %225 }
  0xe2   : > { %232 = vst.msk [vmem:[#allocation2 + $0x1] sm:$0xff] %vm231_vm2, %v226_v10 }
  0xe3   : > { %246 = vst.msk [vmem:[#allocation2 + $0x1] sm:$0xff] %vm245_vm3, %v240_v9 }
  0xe5   : > { %v242_v11 = vpop.permute.xlu1 %241  ;;  %v228_v12 = vpop.permute.xlu0 %227 }
  0xe6   : > { %233 = vst.msk [vmem:[#allocation2 + $0x9] sm:$0xff] %vm231_vm2, %v228_v12 }
  0xe7   : > { %247 = vst.msk [vmem:[#allocation2 + $0x9] sm:$0xff] %vm245_vm3, %v242_v11 }
  0xe9   : > { %v256_v13 = vpop.permute.xlu1 %255  ;;  %v254_v14 = vpop.permute.xlu0 %253 }
  0xea   : > { %261 = vst.msk [vmem:[#allocation2 + $0x9] sm:$0xff] %vm259_vm4, %v256_v13  ;;  %260 = vst.msk [vmem:[#allocation2 + $0x1] sm:$0xff] %vm259_vm4, %v254_v14 }
  0xed   : > { %v270_v15 = vpop.permute.xlu1 %269  ;;  %v268_v16 = vpop.permute.xlu0 %267 }
  0xee   : > { %275 = vst.msk [vmem:[#allocation2 + $0x9] sm:$0xff] %vm273_vm5, %v270_v15  ;;  %274 = vst.msk [vmem:[#allocation2 + $0x1] sm:$0xff] %vm273_vm5, %v268_v16 }
  0xf5   : > { %v1844_v17 = vld [vmem:[#allocation2 + $0x9] sm:$0xff]  ;;  %v1846_v18 = vld [vmem:[#allocation2 + $0x1] sm:$0xff] }
  0xf6   : > { %287 = vrot.lane.b32.xlu1 %v1844_v17, %s1650_s25  ;;  %285 = vrot.lane.b32.xlu0 %v1846_v18, %s1650_s25  ;;  %v1850_v19 = vld [vmem:[#allocation2 + $0x8] sm:$0xff]  ;;  %v1852_v20 = vld [vmem:[#allocation2] sm:$0xff]  ;;  %v319_v29 = vmul.f32 %v1374_v23, %v1844_v17  ;;  %v328_v30 = vmul.f32 %v1375_v24, %v1844_v17  ;;  %v337_v37 = vmul.f32 %v1376_v28, %v1844_v17 }
  0xf7   : > { %v1862_v21 = vld [vmem:[#allocation2 + $0xa] sm:$0xff]  ;;  %v1864_v22 = vld [vmem:[#allocation2 + $0x2] sm:$0xff]  ;;  %v318_v38 = vmul.f32 %v1374_v23, %v1846_v18  ;;  %v327_v44 = vmul.f32 %v1375_v24, %v1846_v18  ;;  %v336_v45 = vmul.f32 %v1376_v28, %v1846_v18  ;;  %v383_v3 = vmul.f32 %v1380_v52, %v1850_v19 }
  0xf8   : > { %v382_v4 = vmul.f32 %v1380_v52, %v1852_v20  ;;  %v392_v9 = vmul.f32 %v1381_v57, %v1850_v19  ;;  %v401_v10 = vmul.f32 %v1382_v58, %v1850_v19  ;;  %v391_v11 = vmul.f32 %v1381_v57, %v1852_v20  ;;  %v1395_v52 = vld [vmem:[#allocation3 + $0x18] ss:$0 sm:$0xff] }
  0xf9   : > { %v400_v12 = vmul.f32 %v1382_v58, %v1852_v20 }
  0xfa   : > { %351 = vrot.lane.b32.xlu1 %v1850_v19, %s1650_s25  ;;  %349 = vrot.lane.b32.xlu0 %v1852_v20, %s1650_s25 }
  0xfe   : > { %518 = vrot.lane.b32.xlu1 %v1844_v17, %s1651_s29  ;;  %516 = vrot.lane.b32.xlu0 %v1846_v18, %s1651_s29 }
 0x102   : > { %551 = vrot.lane.b32.xlu1 %v1844_v17, %s1650_s25  ;;  %549 = vrot.lane.b32.xlu0 %v1846_v18, %s1650_s25 }
 0x106   : > { %588 = vrot.lane.b32.xlu1 %v1850_v19, %s1651_s29  ;;  %586 = vrot.lane.b32.xlu0 %v1852_v20, %s1651_s29 }
 0x10a   : > { %999 = vrot.lane.b32.xlu1 %v1862_v21, %s1651_s29  ;;  %997 = vrot.lane.b32.xlu0 %v1864_v22, %s1651_s29 }
 0x10e   : > { %1032 = vrot.lane.b32.xlu1 %v1862_v21, %s1650_s25  ;;  %1030 = vrot.lane.b32.xlu0 %v1864_v22, %s1650_s25 }
 0x112   : > { %769 = vrot.lane.b32.xlu1 %v1862_v21, %s1650_s25  ;;  %767 = vrot.lane.b32.xlu0 %v1864_v22, %s1650_s25 }
 0x116   : > { %621 = vrot.lane.b32.xlu1 %v1850_v19, %s1650_s25  ;;  %619 = vrot.lane.b32.xlu0 %v1852_v20, %s1650_s25 }
 0x11a   : > { %1069 = vrot.lane.b32.xlu1 %v1844_v17, %s1651_s29  ;;  %1067 = vrot.lane.b32.xlu0 %v1846_v18, %s1651_s29 }
 0x11e   : > { %833 = vrot.lane.b32.xlu1 %v1844_v17, %s1650_s25  ;;  %831 = vrot.lane.b32.xlu0 %v1846_v18, %s1650_s25 }
 0x122   : > { %1102 = vrot.lane.b32.xlu1 %v1844_v17, %s1650_s25  ;;  %1100 = vrot.lane.b32.xlu0 %v1846_v18, %s1650_s25 }
 0x168   : > { %v288_v31 = vpop.permute.xlu1 %287  ;;  %v286_v32 = vpop.permute.xlu0 %285 }
 0x169   : > { %v292_v33 = vmul.f32 %v1371_v25, %v288_v31  ;;  %v301_v34 = vmul.f32 %v1372_v26, %v288_v31  ;;  %v310_v35 = vmul.f32 %v1373_v27, %v288_v31  ;;  %v291_v36 = vmul.f32 %v1371_v25, %v286_v32  ;;  %v1398_v31 = vld [vmem:[#allocation3 + $0x1b] ss:$0 sm:$0xff] }
 0x16a   : > { %v300_v39 = vmul.f32 %v1372_v26, %v286_v32  ;;  %v309_v40 = vmul.f32 %v1373_v27, %v286_v32  ;;  %v1399_v32 = vld [vmem:[#allocation3 + $0x1c] ss:$0 sm:$0xff] }
 0x16b   : > { %v321_v46 = vadd.f32 %v319_v29, %v292_v33  ;;  %v330_v47 = vadd.f32 %v328_v30, %v301_v34  ;;  %v339_v48 = vadd.f32 %v337_v37, %v310_v35  ;;  %v320_v49 = vadd.f32 %v318_v38, %v291_v36  ;;  %v1400_v33 = vld [vmem:[#allocation3 + $0x1d] ss:$0 sm:$0xff]  ;;  %v1386_v34 = vld [vmem:[#allocation3 + $0xf] ss:$0 sm:$0xff]  ;;  %v1404_v37 = vld [vmem:[#allocation3 + $0x21] ss:$0 sm:$0xff] }
 0x16c   : > { %v352_v50 = vpop.permute.xlu1 %351  ;;  %v350_v51 = vpop.permute.xlu0 %349  ;;  %v329_v59 = vadd.f32 %v327_v44, %v300_v39  ;;  %v338_v60 = vadd.f32 %v336_v45, %v309_v40  ;;  %v801_v38 = vmul.f32 %v1398_v31, %v1862_v21  ;;  %v810_v39 = vmul.f32 %v1399_v32, %v1862_v21  ;;  %v1946_v40 = vld [vmem:[#allocation3 + $0x22] ss:$0 sm:$0xff] }
 0x16d   : > { %v356_v53 = vmul.f32 %v1377_v41, %v352_v50  ;;  %v365_v54 = vmul.f32 %v1378_v42, %v352_v50  ;;  %v374_v55 = vmul.f32 %v1379_v43, %v352_v50  ;;  %v355_v56 = vmul.f32 %v1377_v41, %v350_v51  ;;  %v1383_v41 = vld [vmem:[#allocation3 + $0xc] ss:$0 sm:$0xff] }
 0x16e   : > { %v364_v61 = vmul.f32 %v1378_v42, %v350_v51  ;;  %v373_v62 = vmul.f32 %v1379_v43, %v350_v51  ;;  %v1387_v42 = vld [vmem:[#allocation3 + $0x10] ss:$0 sm:$0xff]  ;;  %v819_v43 = vmul.f32 %v1400_v33, %v1862_v21  ;;  %v800_v44 = vmul.f32 %v1398_v31, %v1864_v22 }
 0x16f   : > { %v358_v63 = vadd.f32 %v356_v53, %v321_v46  ;;  %v367_v0 = vadd.f32 %v365_v54, %v330_v47  ;;  %v376_v1 = vadd.f32 %v374_v55, %v339_v48  ;;  %v357_v2 = vadd.f32 %v355_v56, %v320_v49  ;;  %v1384_v46 = vld [vmem:[#allocation3 + $0xd] ss:$0 sm:$0xff]  ;;  %v1389_v48 = vld [vmem:[#allocation3 + $0x12] ss:$0 sm:$0xff]  ;;  %v1396_v53 = vld [vmem:[#allocation3 + $0x19] ss:$0 sm:$0xff] }
 0x170   : > { %v366_v5 = vadd.f32 %v364_v61, %v329_v59  ;;  %v375_v6 = vadd.f32 %v373_v62, %v338_v60  ;;  %v1888_v7 = vpop.permute.xlu1 %518  ;;  %v1890_v8 = vpop.permute.xlu0 %516  ;;  %v1951_v45 = vmul.f32 %v1399_v32, %v1864_v22  ;;  %v818_v49 = vmul.f32 %v1400_v33, %v1864_v22  ;;  %v1397_v54 = vld [vmem:[#allocation3 + $0x1a] ss:$0 sm:$0xff]  ;;  %v1390_v61 = vld [vmem:[#allocation3 + $0x13] ss:$0 sm:$0xff] }
 0x171   : > { %v1896_v13 = vadd.f32 %v383_v3, %v358_v63  ;;  %v1898_v14 = vadd.f32 %v382_v4, %v357_v2  ;;  %v1900_v15 = vadd.f32 %v392_v9, %v367_v0  ;;  %v1904_v23 = vadd.f32 %v401_v10, %v376_v1  ;;  %v1392_v4 = vld [vmem:[#allocation3 + $0x15] ss:$0 sm:$0xff] }
 0x172   : > { %v1902_v16 = vadd.f32 %v391_v11, %v366_v5  ;;  %v1906_v24 = vadd.f32 %v400_v12, %v375_v6  ;;  %v1956_v50 = vmul.f32 %v1404_v37, %v1844_v17  ;;  %v1969_v22 = vmul.f32 %v1946_v40, %v1844_v17 }
 0x173   : > { %2336 = vst [vmem:[#allocation11_spill] sm:$0xff] %v1900_v15  ;;  %408 = vrot.lane.b32.xlu1 %v1896_v13, %s1652_s30  ;;  %406 = vrot.lane.b32.xlu0 %v1898_v14, %s1652_s30  ;;  %v1972_v56 = vmul.f32 %v1404_v37, %v1846_v18  ;;  %v523_v57 = vmul.f32 %v1383_v41, %v1888_v7 }
 0x174   : > { %2337 = vst [vmem:[#allocation12_spill] sm:$0xff] %v1902_v16  ;;  %v1912_v19 = vpop.permute.xlu1 %551  ;;  %v1914_v20 = vpop.permute.xlu0 %549  ;;  %v522_v59 = vmul.f32 %v1383_v41, %v1890_v8  ;;  %v531_v60 = vmul.f32 %v1384_v46, %v1890_v8  ;;  %v532_v12 = vmul.f32 %v1384_v46, %v1888_v7 }
 0x175   : > { %v556_v47 = vmul.f32 %v1386_v34, %v1912_v19  ;;  %v555_v51 = vmul.f32 %v1386_v34, %v1914_v20  ;;  %v564_v58 = vmul.f32 %v1387_v42, %v1914_v20  ;;  %v565_v31 = vmul.f32 %v1387_v42, %v1912_v19 }
 0x177   : > { %416 = vrot.lane.b32.xlu1 %v1896_v13, %s1653_s4  ;;  %414 = vrot.lane.b32.xlu0 %v1898_v14, %s1653_s4  ;;  %v558_v0 = vadd.f32 %v556_v47, %v523_v57  ;;  %v557_v5 = vadd.f32 %v555_v51, %v522_v59  ;;  %v566_v32 = vadd.f32 %v564_v58, %v531_v60  ;;  %v1401_v47 = vld [vmem:[#allocation3 + $0x1e] ss:$0 sm:$0xff]  ;;  %v1403_v51 = vld [vmem:[#allocation3 + $0x20] ss:$0 sm:$0xff] }
 0x178   : > { %v1920_v25 = vpop.permute.xlu1 %588  ;;  %v1922_v26 = vpop.permute.xlu0 %586 }
 0x179   : > { %v593_v62 = vmul.f32 %v1389_v48, %v1920_v25  ;;  %v592_v63 = vmul.f32 %v1389_v48, %v1922_v26  ;;  %v602_v33 = vmul.f32 %v1390_v61, %v1920_v25  ;;  %v601_v37 = vmul.f32 %v1390_v61, %v1922_v26  ;;  %v1402_v48 = vld [vmem:[#allocation3 + $0x1f] ss:$0 sm:$0xff] }
 0x17b   : > { %424 = vrot.lane.b32.xlu1 %v1896_v13, %s1654_s15  ;;  %422 = vrot.lane.b32.xlu0 %v1898_v14, %s1654_s15  ;;  %v595_v34 = vadd.f32 %v593_v62, %v558_v0 }
 0x17c   : > { %v1928_v27 = vpop.permute.xlu1 %999  ;;  %v1930_v28 = vpop.permute.xlu0 %997 }
 0x17f   : > { %437 = vrot.lane.b32.xlu1 %v1900_v15, %s1652_s30  ;;  %435 = vrot.lane.b32.xlu0 %v1902_v16, %s1652_s30 }
 0x180   : > { %v1936_v29 = vpop.permute.xlu1 %1032  ;;  %v1938_v30 = vpop.permute.xlu0 %1030 }
 0x183   : > { %445 = vrot.lane.b32.xlu1 %v1900_v15, %s1653_s4  ;;  %443 = vrot.lane.b32.xlu0 %v1902_v16, %s1653_s4 }
 0x184   : > { %v770_v35 = vpop.permute.xlu1 %769  ;;  %v768_v36 = vpop.permute.xlu0 %767 }
 0x185   : > { %v774_v1 = vmul.f32 %v1395_v52, %v770_v35  ;;  %v783_v2 = vmul.f32 %v1396_v53, %v770_v35  ;;  %v792_v3 = vmul.f32 %v1397_v54, %v770_v35  ;;  %v773_v6 = vmul.f32 %v1395_v52, %v768_v36 }
 0x186   : > { %v791_v9 = vmul.f32 %v1397_v54, %v768_v36  ;;  %v594_v35 = vadd.f32 %v592_v63, %v557_v5  ;;  %v782_v52 = vmul.f32 %v1396_v53, %v768_v36  ;;  %v1393_v54 = vld [vmem:[#allocation3 + $0x16] ss:$0 sm:$0xff]  ;;  %v1388_v53 = vld [vmem:[#allocation3 + $0x11] ss:$0 sm:$0xff] }
 0x187   : > { %453 = vrot.lane.b32.xlu1 %v1900_v15, %s1654_s15  ;;  %451 = vrot.lane.b32.xlu0 %v1902_v16, %s1654_s15  ;;  %v803_v57 = vadd.f32 %v801_v38, %v774_v1  ;;  %v812_v59 = vadd.f32 %v810_v39, %v783_v2  ;;  %v821_v16 = vadd.f32 %v819_v43, %v792_v3  ;;  %v1406_v15 = vld [vmem:[#allocation3 + $0x23] ss:$0 sm:$0xff] }
 0x188   : > { %v1963_v21 = vpop.permute.xlu1 %621  ;;  %v1965_v55 = vpop.permute.xlu0 %619  ;;  %v802_v58 = vadd.f32 %v800_v44, %v773_v6  ;;  %v820_v60 = vadd.f32 %v818_v49, %v791_v9  ;;  %v1385_v44 = vld [vmem:[#allocation3 + $0xe] ss:$0 sm:$0xff]  ;;  %v603_v49 = vadd.f32 %v601_v37, %v566_v32 }
 0x189   : > { %v625_v41 = vmul.f32 %v1392_v4, %v1965_v55  ;;  %v626_v46 = vmul.f32 %v1392_v4, %v1963_v21  ;;  %v634_v38 = vmul.f32 %v1393_v54, %v1965_v55  ;;  %v811_v4 = vadd.f32 %v1951_v45, %v782_v52 }
 0x18a   : > { %v883_v52 = vmul.f32 %v1406_v15, %v1844_v17 }
 0x18b   : > { %474 = vrot.lane.b32.xlu1 %v1904_v23, %s1652_s30  ;;  %472 = vrot.lane.b32.xlu0 %v1906_v24, %s1652_s30  ;;  %v1999_v1 = vadd.f32 %v625_v41, %v594_v35  ;;  %v573_v35 = vmul.f32 %v1388_v53, %v1914_v20  ;;  %v1391_v41 = vld [vmem:[#allocation3 + $0x14] ss:$0 sm:$0xff]  ;;  %v2008_v45 = vadd.f32 %v634_v38, %v603_v49 }
 0x18c   : > { %v1984_v10 = vpop.permute.xlu1 %1069  ;;  %v1986_v11 = vpop.permute.xlu0 %1067  ;;  %v882_v20 = vmul.f32 %v1406_v15, %v1846_v18 }
 0x18f   : > { %482 = vrot.lane.b32.xlu1 %v1904_v23, %s1653_s4  ;;  %480 = vrot.lane.b32.xlu0 %v1906_v24, %s1653_s4 }
 0x190   : > { %v834_v42 = vpop.permute.xlu1 %833  ;;  %v832_v61 = vpop.permute.xlu0 %831 }
 0x191   : > { %v838_v62 = vmul.f32 %v1401_v47, %v834_v42  ;;  %v847_v63 = vmul.f32 %v1402_v48, %v834_v42  ;;  %v856_v0 = vmul.f32 %v1403_v51, %v834_v42  ;;  %v837_v36 = vmul.f32 %v1401_v47, %v832_v61 }
 0x192   : > { %v846_v39 = vmul.f32 %v1402_v48, %v832_v61  ;;  %v855_v43 = vmul.f32 %v1403_v51, %v832_v61  ;;  %v567_v47 = vadd.f32 %v565_v31, %v532_v12  ;;  %v2010_v51 = vadd.f32 %v626_v46, %v595_v34 }
 0x193   : > { %v840_v2 = vadd.f32 %v838_v62, %v803_v57  ;;  %v858_v3 = vadd.f32 %v856_v0, %v821_v16  ;;  %v839_v5 = vadd.f32 %v837_v36, %v802_v58  ;;  %v849_v6 = vadd.f32 %v847_v63, %v812_v59  ;;  %649 = vrot.lane.b32.xlu1 %v1999_v1, %s1652_s30  ;;  %v1394_v57 = vld [vmem:[#allocation3 + $0x17] ss:$0 sm:$0xff] }
 0x194   : > { %v857_v9 = vadd.f32 %v855_v43, %v820_v60  ;;  %488 = vrot.lane.b32.xlu0 %v1906_v24, %s1654_s15  ;;  %v635_v16 = vmul.f32 %v1393_v54, %v1963_v21  ;;  %v848_v48 = vadd.f32 %v846_v39, %v811_v4  ;;  %v873_v12 = vmul.f32 %v1946_v40, %v1846_v18  ;;  %v1410_v54 = vld [vmem:[#allocation3 + $0x27] ss:$0 sm:$0xff]  ;;  %v1413_v18 = vld [vmem:[#allocation3 + $0x2a] ss:$0 sm:$0xff]  ;;  %v2044_v60 = vpop.permute.xlu0 %1100  ;;  %v1103_v39 = vpop.permute.xlu1 %1102 }
 0x195   : > { %v2013_v32 = vadd.f32 %v1956_v50, %v840_v2  ;;  %v2016_v37 = vadd.f32 %v1972_v56, %v839_v5  ;;  %v540_v31 = vmul.f32 %v1385_v44, %v1890_v8  ;;  %v604_v59 = vadd.f32 %v602_v33, %v567_v47  ;;  %v1407_v50 = vld [vmem:[#allocation3 + $0x24] ss:$0 sm:$0xff]  ;;  %v1408_v47 = vld [vmem:[#allocation3 + $0x25] ss:$0 sm:$0xff] }
 0x196   : > { %v610_v34 = vmul.f32 %v1391_v41, %v1922_v26  ;;  %v2029_v17 = vadd.f32 %v1969_v22, %v849_v6  ;;  %v574_v40 = vmul.f32 %v1388_v53, %v1912_v19  ;;  %v2032_v15 = vadd.f32 %v873_v12, %v848_v48  ;;  %v1416_v19 = vld [vmem:[#allocation3 + $0x2d] ss:$0 sm:$0xff] }
 0x197   : > { %686 = vrot.lane.b32.xlu1 %v2008_v45, %s1652_s30  ;;  %v2034_v8 = vadd.f32 %v883_v52, %v858_v3  ;;  %v2036_v56 = vadd.f32 %v882_v20, %v857_v9  ;;  %v575_v26 = vadd.f32 %v573_v35, %v540_v31  ;;  %v1036_v33 = vmul.f32 %v1410_v54, %v1938_v30  ;;  %v1411_v9 = vld [vmem:[#allocation3 + $0x28] ss:$0 sm:$0xff]  ;;  %v1414_v35 = vld [vmem:[#allocation3 + $0x2b] ss:$0 sm:$0xff]  ;;  %v1417_v52 = vld [vmem:[#allocation3 + $0x2e] ss:$0 sm:$0xff] }
 0x198   : > { %651 = vrot.lane.b32.xlu0 %v2010_v51, %s1652_s30  ;;  %v643_v46 = vmul.f32 %v1394_v57, %v1965_v55  ;;  %v2040_v42 = vadd.f32 %v635_v16, %v604_v59  ;;  %v541_v22 = vmul.f32 %v1385_v44, %v1888_v7  ;;  %v611_v58 = vmul.f32 %v1391_v41, %v1920_v25 }
 0x199   : > { %v612_v61 = vadd.f32 %v610_v34, %v575_v26  ;;  %v1003_v62 = vmul.f32 %v1407_v50, %v1930_v28  ;;  %v1073_v63 = vmul.f32 %v1413_v18, %v1986_v11  ;;  %v1037_v0 = vmul.f32 %v1410_v54, %v1936_v29 }
 0x19a   : > { %v576_v55 = vadd.f32 %v574_v40, %v541_v22  ;;  %v644_v7 = vmul.f32 %v1394_v57, %v1963_v21  ;;  %v1106_v36 = vmul.f32 %v1416_v19, %v2044_v60  ;;  %v1004_v43 = vmul.f32 %v1407_v50, %v1928_v27  ;;  %v1415_v22 = vld [vmem:[#allocation3 + $0x2c] ss:$0 sm:$0xff] }
 0x19b   : > { %657 = vrot.lane.b32.xlu1 %v1999_v1, %s1653_s4  ;;  %v1038_v25 = vadd.f32 %v1036_v33, %v1003_v62  ;;  %v2055_v53 = vadd.f32 %v643_v46, %v612_v61  ;;  %v1074_v2 = vmul.f32 %v1413_v18, %v1984_v10  ;;  %v1107_v21 = vmul.f32 %v1416_v19, %v1103_v39  ;;  %v1412_v33 = vld [vmem:[#allocation3 + $0x29] ss:$0 sm:$0xff]  ;;  %v1409_v46 = vld [vmem:[#allocation3 + $0x26] ss:$0 sm:$0xff]  ;;  %v1418_v62 = vld [vmem:[#allocation3 + $0x2f] ss:$0 sm:$0xff] }
 0x19c   : > { %688 = vrot.lane.b32.xlu0 %v2040_v42, %s1652_s30  ;;  %v613_v38 = vadd.f32 %v611_v58, %v576_v55  ;;  %v1039_v4 = vadd.f32 %v1037_v0, %v1004_v43  ;;  %v1046_v41 = vmul.f32 %v1411_v9, %v1936_v29  ;;  %v1045_v16 = vmul.f32 %v1411_v9, %v1938_v30 }
 0x19d   : > { %v1075_v3 = vadd.f32 %v1073_v63, %v1038_v25  ;;  %v1013_v48 = vmul.f32 %v1408_v47, %v1928_v27  ;;  %v1012_v12 = vmul.f32 %v1408_v47, %v1930_v28  ;;  %v1083_v20 = vmul.f32 %v1414_v35, %v1984_v10 }
 0x19e   : > { %v2065_v44 = vadd.f32 %v644_v7, %v613_v38  ;;  %v1076_v49 = vadd.f32 %v1074_v2, %v1039_v4  ;;  %v1082_v31 = vmul.f32 %v1414_v35, %v1986_v11  ;;  %v1116_v59 = vmul.f32 %v1417_v52, %v1103_v39 }
 0x19f   : > { %723 = vrot.lane.b32.xlu1 %v2055_v53, %s1652_s30  ;;  %v2063_v5 = vadd.f32 %v1106_v36, %v1075_v3  ;;  %v1048_v54 = vadd.f32 %v1046_v41, %v1013_v48  ;;  %v1047_v57 = vadd.f32 %v1045_v16, %v1012_v12  ;;  %v1115_v34 = vmul.f32 %v1417_v52, %v2044_v60  ;;  %v2338_v52 = vld [vmem:[#allocation11_spill] sm:$0xff] }
 0x1a0   : > { %659 = vrot.lane.b32.xlu0 %v2010_v51, %s1653_s4  ;;  %v2071_v6 = vadd.f32 %v1107_v21, %v1076_v49  ;;  %v1055_v58 = vmul.f32 %v1412_v33, %v1936_v29  ;;  %v1054_v19 = vmul.f32 %v1412_v33, %v1938_v30  ;;  %v1022_v61 = vmul.f32 %v1409_v46, %v1928_v27 }
 0x1a1   : > { %v1085_v40 = vadd.f32 %v1083_v20, %v1048_v54  ;;  %v1084_v50 = vadd.f32 %v1082_v31, %v1047_v57  ;;  %v1021_v63 = vmul.f32 %v1409_v46, %v1930_v28  ;;  %v1092_v55 = vmul.f32 %v1415_v22, %v1984_v10  ;;  %v2339_v20 = vld [vmem:[#allocation12_spill] sm:$0xff] }
 0x1a2   : > { %v1091_v0 = vmul.f32 %v1415_v22, %v1986_v11  ;;  %v1057_v7 = vadd.f32 %v1055_v58, %v1022_v61  ;;  %v1125_v29 = vmul.f32 %v1418_v62, %v1103_v39  ;;  %v1124_v30 = vmul.f32 %v1418_v62, %v2044_v60 }
 0x1a3   : > { %1130 = vrot.lane.b32.xlu1 %v2063_v5, %s1652_s30  ;;  %v2092_v18 = vadd.f32 %v1116_v59, %v1085_v40  ;;  %v2094_v26 = vadd.f32 %v1115_v34, %v1084_v50  ;;  %v1056_v25 = vadd.f32 %v1054_v19, %v1021_v63 }
 0x1a4   : > { %725 = vrot.lane.b32.xlu0 %v2065_v44, %s1652_s30  ;;  %v1094_v36 = vadd.f32 %v1092_v55, %v1057_v7 }
 0x1a5   : > { %v1093_v27 = vadd.f32 %v1091_v0, %v1056_v25 }
 0x1a6   : > { %v2123_v28 = vadd.f32 %v1125_v29, %v1094_v36 }
 0x1a7   : > { %490 = vrot.lane.b32.xlu1 %v1904_v23, %s1654_s15  ;;  %v2125_v10 = vadd.f32 %v1124_v30, %v1093_v27 }
 0x1a8   : > { %1132 = vrot.lane.b32.xlu0 %v2071_v6, %s1652_s30 }
 0x1ab   : > { %696 = vrot.lane.b32.xlu1 %v2040_v42, %s1653_s4 }
 0x1ac   : > { %694 = vrot.lane.b32.xlu0 %v2008_v45, %s1653_s4 }
 0x1af   : > { %890 = vrot.lane.b32.xlu1 %v2013_v32, %s1652_s30 }
 0x1b0   : > { %888 = vrot.lane.b32.xlu0 %v2016_v37, %s1652_s30 }
 0x1b3   : > { %1168 = vrot.lane.b32.xlu1 %v2092_v18, %s1652_s30 }
 0x1b4   : > { %1166 = vrot.lane.b32.xlu0 %v2094_v26, %s1652_s30 }
 0x1b7   : > { %667 = vrot.lane.b32.xlu1 %v2010_v51, %s1654_s15 }
 0x1b8   : > { %665 = vrot.lane.b32.xlu0 %v1999_v1, %s1654_s15 }
 0x1bb   : > { %733 = vrot.lane.b32.xlu1 %v2065_v44, %s1653_s4 }
 0x1bc   : > { %731 = vrot.lane.b32.xlu0 %v2055_v53, %s1653_s4 }
 0x1bf   : > { %927 = vrot.lane.b32.xlu1 %v2029_v17, %s1652_s30 }
 0x1c0   : > { %925 = vrot.lane.b32.xlu0 %v2032_v15, %s1652_s30 }
 0x1c3   : > { %1140 = vrot.lane.b32.xlu1 %v2071_v6, %s1653_s4 }
 0x1c4   : > { %1138 = vrot.lane.b32.xlu0 %v2063_v5, %s1653_s4 }
 0x1c7   : > { %1204 = vrot.lane.b32.xlu1 %v2123_v28, %s1652_s30 }
 0x1c8   : > { %1202 = vrot.lane.b32.xlu0 %v2125_v10, %s1652_s30 }
 0x1cb   : > { %704 = vrot.lane.b32.xlu1 %v2040_v42, %s1654_s15 }
 0x1cc   : > { %702 = vrot.lane.b32.xlu0 %v2008_v45, %s1654_s15 }
 0x1cf   : > { %898 = vrot.lane.b32.xlu1 %v2013_v32, %s1653_s4 }
 0x1d0   : > { %896 = vrot.lane.b32.xlu0 %v2016_v37, %s1653_s4 }
 0x1d3   : > { %1176 = vrot.lane.b32.xlu1 %v2092_v18, %s1653_s4 }
 0x1d4   : > { %1174 = vrot.lane.b32.xlu0 %v2094_v26, %s1653_s4 }
 0x1d7   : > { %741 = vrot.lane.b32.xlu1 %v2065_v44, %s1654_s15 }
 0x1d8   : > { %739 = vrot.lane.b32.xlu0 %v2055_v53, %s1654_s15 }
 0x1db   : > { %935 = vrot.lane.b32.xlu1 %v2029_v17, %s1653_s4 }
 0x1dc   : > { %933 = vrot.lane.b32.xlu0 %v2032_v15, %s1653_s4 }
 0x1df   : > { %1148 = vrot.lane.b32.xlu1 %v2071_v6, %s1654_s15 }
 0x1e0   : > { %1146 = vrot.lane.b32.xlu0 %v2063_v5, %s1654_s15 }
 0x1e3   : > { %1212 = vrot.lane.b32.xlu1 %v2123_v28, %s1653_s4 }
 0x1e4   : > { %1210 = vrot.lane.b32.xlu0 %v2125_v10, %s1653_s4 }
 0x1e5   : > { %v409_v11 = vpop.permute.xlu1 %408  ;;  %v407_v60 = vpop.permute.xlu0 %406 }
 0x1e6   : > { %v413_v43 = vadd.f32 %v409_v11, %v1896_v13  ;;  %v412_v2 = vadd.f32 %v407_v60, %v1898_v14 }
 0x1e7   : > { %906 = vrot.lane.b32.xlu1 %v2013_v32, %s1654_s15 }
 0x1e8   : > { %904 = vrot.lane.b32.xlu0 %v2016_v37, %s1654_s15 }
 0x1e9   : > { %v417_v38 = vpop.permute.xlu1 %416  ;;  %v415_v39 = vpop.permute.xlu0 %414 }
 0x1ea   : > { %v421_v3 = vadd.f32 %v417_v38, %v413_v43  ;;  %v420_v4 = vadd.f32 %v415_v39, %v412_v2 }
 0x1eb   : > { %1184 = vrot.lane.b32.xlu1 %v2092_v18, %s1654_s15 }
 0x1ec   : > { %1182 = vrot.lane.b32.xlu0 %v2094_v26, %s1654_s15 }
 0x1ed   : > { %v425_v13 = vpop.permute.xlu1 %424  ;;  %v423_v21 = vpop.permute.xlu0 %422 }
 0x1ee   : > { %v429_v14 = vadd.f32 %v425_v13, %v421_v3  ;;  %v428_v49 = vadd.f32 %v423_v21, %v420_v4 }
 0x1ef   : > { %943 = vrot.lane.b32.xlu1 %v2029_v17, %s1654_s15 }
 0x1f0   : > { %941 = vrot.lane.b32.xlu0 %v2032_v15, %s1654_s15  ;;  %432 = vst.msk [vmem:[%s2174_s6 + $0x10] sm:$0xff] %vm430_vm6, %v429_v14  ;;  %431 = vst.msk [vmem:[%s2174_s6] sm:$0xff] %vm430_vm6, %v428_v49 }
 0x1f1   : > { %v438_v9 = vpop.permute.xlu1 %437  ;;  %v436_v47 = vpop.permute.xlu0 %435 }
 0x1f2   : > { %v442_v12 = vadd.f32 %v438_v9, %v2338_v52  ;;  %v441_v31 = vadd.f32 %v436_v47, %v2339_v20 }
 0x1f3   : > { %1220 = vrot.lane.b32.xlu1 %v2123_v28, %s1654_s15 }
 0x1f4   : > { %1218 = vrot.lane.b32.xlu0 %v2125_v10, %s1654_s15 }
 0x1f5   : > { %v446_v35 = vpop.permute.xlu1 %445  ;;  %v444_v41 = vpop.permute.xlu0 %443 }
 0x1f6   : > { %v450_v59 = vadd.f32 %v446_v35, %v442_v12  ;;  %v449_v34 = vadd.f32 %v444_v41, %v441_v31 }
 0x1f7   : > { %964 = vrot.lane.b32.xlu1 %v2034_v8, %s1652_s30 }
 0x1f8   : > { %962 = vrot.lane.b32.xlu0 %v2036_v56, %s1652_s30 }
 0x1f9   : > { %v454_v16 = vpop.permute.xlu1 %453  ;;  %v452_v48 = vpop.permute.xlu0 %451 }
 0x1fa   : > { %v458_v40 = vadd.f32 %v454_v16, %v450_v59  ;;  %v457_v50 = vadd.f32 %v452_v48, %v449_v34 }
 0x1fb   : > { %972 = vrot.lane.b32.xlu1 %v2034_v8, %s1653_s4 }
 0x1fc   : > { %970 = vrot.lane.b32.xlu0 %v2036_v56, %s1653_s4 }
 0x1fd   : > { %v475_v54 = vpop.permute.xlu1 %474  ;;  %v473_v57 = vpop.permute.xlu0 %472 }
 0x1fe   : > { %v478_v22 = vadd.f32 %v473_v57, %v1906_v24  ;;  %v479_v36 = vadd.f32 %v475_v54, %v1904_v23 }
 0x1ff   : > { %980 = vrot.lane.b32.xlu1 %v2034_v8, %s1654_s15 }
 0x200   : > { %978 = vrot.lane.b32.xlu0 %v2036_v56, %s1654_s15 }
 0x201   : > { %v483_v33 = vpop.permute.xlu1 %482  ;;  %v481_v46 = vpop.permute.xlu0 %480 }
 0x202   : > { %v486_v58 = vadd.f32 %v481_v46, %v478_v22  ;;  %v487_v27 = vadd.f32 %v483_v33, %v479_v36 }
 0x203   : > { %463 = vrot.lane.b32.xlu1 %v458_v40, %s1655_s16 }
 0x204   : > { %461 = vrot.lane.b32.xlu0 %v457_v50, %s1655_s16 }
 0x205   : > { %v650_v19 = vpop.permute.xlu1 %649 }
 0x206   : > { %v489_v61 = vpop.permute.xlu0 %488  ;;  %v655_v21 = vadd.f32 %v650_v19, %v1999_v1 }
 0x207   : > { %v494_v62 = vadd.f32 %v489_v61, %v486_v58 }
 0x209   : > { %498 = vrot.lane.b32.xlu0 %v494_v62, %s1656_s19  ;;  %v687_v63 = vpop.permute.xlu1 %686 }
 0x20a   : > { %v652_v55 = vpop.permute.xlu0 %651  ;;  %v692_v54 = vadd.f32 %v687_v63, %v2008_v45 }
 0x20b   : > { %v656_v23 = vadd.f32 %v652_v55, %v2010_v51 }
 0x20d   : > { %v658_v0 = vpop.permute.xlu1 %657 }
 0x20e   : > { %v689_v7 = vpop.permute.xlu0 %688  ;;  %v663_v14 = vadd.f32 %v658_v0, %v655_v21 }
 0x20f   : > { %v693_v57 = vadd.f32 %v689_v7, %v2040_v42 }
 0x211   : > { %v724_v25 = vpop.permute.xlu1 %723 }
 0x212   : > { %v660_v29 = vpop.permute.xlu0 %659  ;;  %v729_v62 = vadd.f32 %v724_v25, %v2055_v53 }
 0x213   : > { %v664_v49 = vadd.f32 %v660_v29, %v656_v23 }
 0x215   : > { %v1131_v30 = vpop.permute.xlu1 %1130 }
 0x216   : > { %v726_v24 = vpop.permute.xlu0 %725 }
 0x217   : > { %v730_v55 = vadd.f32 %v726_v24, %v2065_v44 }
 0x219   : > { %v491_v11 = vpop.permute.xlu1 %490 }
 0x21a   : > { %v1133_v60 = vpop.permute.xlu0 %1132  ;;  %v495_v38 = vadd.f32 %v491_v11, %v487_v27  ;;  %v1136_v11 = vadd.f32 %v1131_v30, %v2063_v5 }
 0x21c   : > { %500 = vrot.lane.b32.xlu1 %v495_v38, %s1656_s19  ;;  %v1137_v38 = vadd.f32 %v1133_v60, %v2071_v6 }
 0x21d   : > { %v697_v39 = vpop.permute.xlu1 %696 }
 0x21e   : > { %v695_v43 = vpop.permute.xlu0 %694  ;;  %v701_v59 = vadd.f32 %v697_v39, %v693_v57 }
 0x21f   : > { %v700_v34 = vadd.f32 %v695_v43, %v692_v54 }
 0x221   : > { %v2208_v2 = vpop.permute.xlu1 %890 }
 0x222   : > { %v2210_v3 = vpop.permute.xlu0 %888 }
 0x223   : > { %v894_v5 = vadd.f32 %v2210_v3, %v2016_v37 }
 0x225   : > { %v2212_v4 = vpop.permute.xlu1 %1168 }
 0x226   : > { %v2214_v13 = vpop.permute.xlu0 %1166 }
 0x229   : > { %v668_v9 = vpop.permute.xlu1 %667 }
 0x22a   : > { %v666_v47 = vpop.permute.xlu0 %665  ;;  %v672_v35 = vadd.f32 %v668_v9, %v664_v49  ;;  %v1173_v9 = vadd.f32 %v2212_v4, %v2092_v18 }
 0x22b   : > { %v671_v41 = vadd.f32 %v666_v47, %v663_v14  ;;  %v895_v14 = vadd.f32 %v2208_v2, %v2013_v32  ;;  %v1172_v47 = vadd.f32 %v2214_v13, %v2094_v26 }
 0x22c   : > { %677 = vrot.lane.b32.xlu1 %v672_v35, %s1657_s7 }
 0x22d   : > { %675 = vrot.lane.b32.xlu0 %v671_v41, %s1657_s7  ;;  %v734_v16 = vpop.permute.xlu1 %733 }
 0x22e   : > { %v732_v48 = vpop.permute.xlu0 %731  ;;  %v738_v45 = vadd.f32 %v734_v16, %v730_v55 }
 0x22f   : > { %v737_v63 = vadd.f32 %v732_v48, %v729_v62 }
 0x231   : > { %v2220_v52 = vpop.permute.xlu1 %927 }
 0x232   : > { %v2222_v12 = vpop.permute.xlu0 %925  ;;  %v932_v37 = vadd.f32 %v2220_v52, %v2029_v17 }
 0x233   : > { %v931_v3 = vadd.f32 %v2222_v12, %v2032_v15 }
 0x235   : > { %v1141_v1 = vpop.permute.xlu1 %1140 }
 0x236   : > { %v1139_v20 = vpop.permute.xlu0 %1138  ;;  %v1145_v39 = vadd.f32 %v1141_v1, %v1137_v38 }
 0x237   : > { %v1144_v43 = vadd.f32 %v1139_v20, %v1136_v11 }
 0x239   : > { %v2224_v51 = vpop.permute.xlu1 %1204 }
 0x23a   : > { %v2226_v31 = vpop.permute.xlu0 %1202  ;;  %v1209_v54 = vadd.f32 %v2224_v51, %v2123_v28 }
 0x23b   : > { %v1208_v57 = vadd.f32 %v2226_v31, %v2125_v10 }
 0x23d   : > { %v705_v40 = vpop.permute.xlu1 %704 }
 0x23e   : > { %v703_v50 = vpop.permute.xlu0 %702  ;;  %v709_v33 = vadd.f32 %v705_v40, %v701_v59 }
 0x23f   : > { %v708_v46 = vadd.f32 %v703_v50, %v700_v34 }
 0x240   : > { %714 = vrot.lane.b32.xlu1 %v709_v33, %s1658_s10 }
 0x241   : > { %712 = vrot.lane.b32.xlu0 %v708_v46, %s1658_s10  ;;  %v899_v22 = vpop.permute.xlu1 %898 }
 0x242   : > { %v897_v58 = vpop.permute.xlu0 %896  ;;  %v903_v30 = vadd.f32 %v899_v22, %v895_v14 }
 0x243   : > { %v902_v6 = vadd.f32 %v897_v58, %v894_v5  ;;  %v1240_v5 = vld [vmem:[#allocation5] sm:$0x3] }
 0x245   : > { %v1177_v19 = vpop.permute.xlu1 %1176 }
 0x246   : > { %v1175_v61 = vpop.permute.xlu0 %1174  ;;  %v1181_v16 = vadd.f32 %v1177_v19, %v1173_v9 }
 0x247   : > { %v1180_v48 = vadd.f32 %v1175_v61, %v1172_v47 }
 0x249   : > { %v742_v42 = vpop.permute.xlu1 %741 }
 0x24a   : > { %v740_v0 = vpop.permute.xlu0 %739  ;;  %v746_v7 = vadd.f32 %v742_v42, %v738_v45 }
 0x24b   : > { %v745_v29 = vadd.f32 %v740_v0, %v737_v63 }
 0x24c   : > { %751 = vrot.lane.b32.xlu1 %v746_v7, %s1659_s11 }
 0x24d   : > { %749 = vrot.lane.b32.xlu0 %v745_v29, %s1659_s11  ;;  %v936_v36 = vpop.permute.xlu1 %935 }
 0x24e   : > { %v934_v27 = vpop.permute.xlu0 %933  ;;  %v940_v4 = vadd.f32 %v936_v36, %v932_v37 }
 0x24f   : > { %v939_v20 = vadd.f32 %v934_v27, %v931_v3 }
 0x251   : > { %v1149_v53 = vpop.permute.xlu1 %1148 }
 0x252   : > { %v1147_v25 = vpop.permute.xlu0 %1146  ;;  %v1153_v44 = vadd.f32 %v1149_v53, %v1145_v39  ;;  %v1242_v53 = vlaneseq }
 0x253   : > { %v1152_v24 = vadd.f32 %v1147_v25, %v1144_v43 }
 0x254   : > { %1158 = vrot.lane.b32.xlu1 %v1153_v44, %s1655_s16 }
 0x255   : > { %1156 = vrot.lane.b32.xlu0 %v1152_v24, %s1655_s16  ;;  %v1213_v21 = vpop.permute.xlu1 %1212  ;;  %v1243_v24 = vshrl.u32 %v1242_v53, 7 }
 0x256   : > { %v1211_v23 = vpop.permute.xlu0 %1210  ;;  %v1217_v59 = vadd.f32 %v1213_v21, %v1209_v54 }
 0x257   : > { %v1216_v15 = vadd.f32 %v1211_v23, %v1208_v57  ;;  %v1244_v14 = vsub.s32 0, %v1243_v24 }
 0x259   : > { %v907_v60 = vpop.permute.xlu1 %906 }
 0x25a   : > { %v905_v49 = vpop.permute.xlu0 %904  ;;  %v911_v35 = vadd.f32 %v907_v60, %v903_v30  ;;  %v1245_v60 = vrot.slane %v1240_v5, %v1244_v14 }
 0x25b   : > { %v910_v41 = vadd.f32 %v905_v49, %v902_v6  ;;  %v1248_v49 = vsub.s32 1, %v1243_v24 }
 0x25c   : > { %916 = vrot.lane.b32.xlu1 %v911_v35, %s1660_s26 }
 0x25d   : > { %914 = vrot.lane.b32.xlu0 %v910_v41, %s1660_s26  ;;  %v1185_v32 = vpop.permute.xlu1 %1184  ;;  %v1249_v35 = vrot.slane %v1240_v5, %v1248_v49 }
 0x25e   : > { %v1183_v2 = vpop.permute.xlu0 %1182  ;;  %v1189_v1 = vadd.f32 %v1185_v32, %v1181_v16 }
 0x25f   : > { %v1188_v18 = vadd.f32 %v1183_v2, %v1180_v48 }
 0x260   : > { %1194 = vrot.lane.b32.xlu1 %v1189_v1, %s1656_s19 }
 0x261   : > { %1192 = vrot.lane.b32.xlu0 %v1188_v18, %s1656_s19  ;;  %v944_v26 = vpop.permute.xlu1 %943 }
 0x262   : > { %v942_v13 = vpop.permute.xlu0 %941  ;;  %v948_v17 = vadd.f32 %v944_v26, %v940_v4 }
 0x263   : > { %v947_v52 = vadd.f32 %v942_v13, %v939_v20 }
 0x264   : > { %953 = vrot.lane.b32.xlu1 %v948_v17, %s1661_s8 }
 0x265   : > { %951 = vrot.lane.b32.xlu0 %v947_v52, %s1661_s8  ;;  %v1221_v12 = vpop.permute.xlu1 %1220 }
 0x266   : > { %v1219_v34 = vpop.permute.xlu0 %1218  ;;  %v1225_v40 = vadd.f32 %v1221_v12, %v1217_v59 }
 0x267   : > { %v1224_v50 = vadd.f32 %v1219_v34, %v1216_v15 }
 0x268   : > { %1230 = vrot.lane.b32.xlu1 %v1225_v40, %s1657_s7 }
 0x269   : > { %1228 = vrot.lane.b32.xlu0 %v1224_v50, %s1657_s7  ;;  %v965_v28 = vpop.permute.xlu1 %964 }
 0x26a   : > { %v963_v51 = vpop.permute.xlu0 %962  ;;  %v969_v33 = vadd.f32 %v965_v28, %v2034_v8 }
 0x26b   : > { %v968_v46 = vadd.f32 %v963_v51, %v2036_v56 }
 0x26d   : > { %v973_v10 = vpop.permute.xlu1 %972 }
 0x26e   : > { %v971_v31 = vpop.permute.xlu0 %970  ;;  %v977_v22 = vadd.f32 %v973_v10, %v969_v33 }
 0x26f   : > { %v976_v58 = vadd.f32 %v971_v31, %v968_v46 }
 0x271   : > { %v981_v19 = vpop.permute.xlu1 %980 }
 0x272   : > { %v979_v61 = vpop.permute.xlu0 %978  ;;  %v985_v62 = vadd.f32 %v981_v19, %v977_v22 }
 0x273   : > { %v984_v55 = vadd.f32 %v979_v61, %v976_v58 }
 0x274   : > { %987 = vst.msk [vmem:[%s2174_s6 + $0x18] sm:$0xff] %vm430_vm6, %v985_v62 }
 0x275   : > { %986 = vst.msk [vmem:[%s2174_s6 + $0x8] sm:$0xff] %vm430_vm6, %v984_v55  ;;  %v464_v45 = vpop.permute.xlu1 %463 }
 0x276   : > { %v462_v63 = vpop.permute.xlu0 %461  ;;  %469 = vst.msk [vmem:[%s2174_s6 + $0x10] sm:$0xff] %vm467_vm7, %v464_v45 }
 0x277   : > { %468 = vst.msk [vmem:[%s2174_s6] sm:$0xff] %vm467_vm7, %v462_v63 }
 0x27b   : > { %v499_v8 = vpop.permute.xlu0 %498 }
 0x27c   : > { %505 = vst.msk [vmem:[%s2174_s6] sm:$0xff] %vm504_vm8, %v499_v8 }
 0x28e   : > { %v501_v56 = vpop.permute.xlu1 %500 }
 0x28f   : > { %506 = vst.msk [vmem:[%s2174_s6 + $0x10] sm:$0xff] %vm504_vm8, %v501_v56 }
 0x29e   : > { %v678_v42 = vpop.permute.xlu1 %677 }
 0x29f   : > { %v676_v0 = vpop.permute.xlu0 %675  ;;  %683 = vst.msk [vmem:[%s2174_s6 + $0x10] sm:$0xff] %vm681_vm9, %v678_v42 }
 0x2a0   : > { %682 = vst.msk [vmem:[%s2174_s6] sm:$0xff] %vm681_vm9, %v676_v0 }
 0x2b2   : > { %v715_v7 = vpop.permute.xlu1 %714 }
 0x2b3   : > { %v713_v29 = vpop.permute.xlu0 %712  ;;  %720 = vst.msk [vmem:[%s2174_s6 + $0x10] sm:$0xff] %vm718_vm10, %v715_v7 }
 0x2b4   : > { %719 = vst.msk [vmem:[%s2174_s6] sm:$0xff] %vm718_vm10, %v713_v29 }
 0x2be   : > { %v752_v36 = vpop.permute.xlu1 %751 }
 0x2bf   : > { %v750_v27 = vpop.permute.xlu0 %749  ;;  %757 = vst.msk [vmem:[%s2174_s6 + $0x10] sm:$0xff] %vm755_vm11, %v752_v36 }
 0x2c0   : > { %756 = vst.msk [vmem:[%s2174_s6] sm:$0xff] %vm755_vm11, %v750_v27 }
 0x2c6   : > { %v1159_v11 = vpop.permute.xlu1 %1158 }
 0x2c7   : > { %v1157_v38 = vpop.permute.xlu0 %1156  ;;  %1163 = vst.msk [vmem:[%s2174_s6 + $0x18] sm:$0xff] %vm467_vm7, %v1159_v11 }
 0x2c8   : > { %1162 = vst.msk [vmem:[%s2174_s6 + $0x8] sm:$0xff] %vm467_vm7, %v1157_v38 }
 0x2ce   : > { %v917_v39 = vpop.permute.xlu1 %916 }
 0x2cf   : > { %v915_v43 = vpop.permute.xlu0 %914  ;;  %922 = vst.msk [vmem:[%s2174_s6 + $0x10] sm:$0xff] %vm920_vm12, %v917_v39 }
 0x2d0   : > { %921 = vst.msk [vmem:[%s2174_s6] sm:$0xff] %vm920_vm12, %v915_v43 }
 0x2d2   : > { %v1195_v25 = vpop.permute.xlu1 %1194 }
 0x2d3   : > { %v1193_v44 = vpop.permute.xlu0 %1192  ;;  %1199 = vst.msk [vmem:[%s2174_s6 + $0x18] sm:$0xff] %vm504_vm8, %v1195_v25 }
 0x2d4   : > { %1198 = vst.msk [vmem:[%s2174_s6 + $0x8] sm:$0xff] %vm504_vm8, %v1193_v44 }
 0x2d6   : > { %v954_v21 = vpop.permute.xlu1 %953 }
 0x2d7   : > { %v952_v23 = vpop.permute.xlu0 %951  ;;  %959 = vst.msk [vmem:[%s2174_s6 + $0x10] sm:$0xff] %vm957_vm13, %v954_v21 }
 0x2d8   : > { %958 = vst.msk [vmem:[%s2174_s6] sm:$0xff] %vm957_vm13, %v952_v23 }
 0x2da   : > { %v1231_v30 = vpop.permute.xlu1 %1230 }
 0x2db   : > { %v1229_v6 = vpop.permute.xlu0 %1228  ;;  %1235 = vst.msk [vmem:[%s2174_s6 + $0x18] sm:$0xff] %vm681_vm9, %v1231_v30 }
 0x2dc   : > { %1234 = vst.msk [vmem:[%s2174_s6 + $0x8] sm:$0xff] %vm681_vm9, %v1229_v6 }
 0x2de   : > { %v1238_v9 = vld [vmem:[%s2174_s6 + $0x10] sm:$0xff] }
 0x2df   : > { %v1236_v47 = vld [vmem:[%s2174_s6] sm:$0xff]  ;;  %v1254_v41 = vadd.f32 %v1245_v60, %v1238_v9 }
 0x2e0   : > { %v1252_v16 = vadd.f32 %v1245_v60, %v1236_v47 }
 0x2e1   : > { %1502 = vtanh.f32 %v1254_v41 }
 0x2e2   : > { %1504 = vtanh.f32 %v1252_v16  ;;  %v1239_v48 = vld [vmem:[%s2174_s6 + $0x18] sm:$0xff] }
 0x2e3   : > { %v1237_v32 = vld [vmem:[%s2174_s6 + $0x8] sm:$0xff]  ;;  %v1255_v2 = vadd.f32 %v1249_v35, %v1239_v48 }
 0x2e4   : > { %v1253_v37 = vadd.f32 %v1249_v35, %v1237_v32 }
 0x2e5   : > { %1506 = vtanh.f32 %v1255_v2 }
 0x2e6   : > { %1508 = vtanh.f32 %v1253_v37 }
 0x2eb   : > { %v1503_v3 = vpop.eup %1502 }
 0x2ec   : > { %v1505_v1 = vpop.eup %1504  ;;  %1263 = vst [vmem:[%s2174_s6 + $0x10] sm:$0xff] %v1503_v3 }
 0x2ed   : > { %1260 = vst [vmem:[%s2174_s6] sm:$0xff] %v1505_v1 }
 0x2ef   : > { %v1507_v18 = vpop.eup %1506 }
 0x2f0   : > { %v1509_v4 = vpop.eup %1508  ;;  %1264 = vst.msk [vmem:[%s2174_s6 + $0x18] sm:$0xff] %vm1261_vm14, %v1507_v18 }
 0x2f1   : > { %1262 = vst.msk [vmem:[%s2174_s6 + $0x8] sm:$0xff] %vm1261_vm14, %v1509_v4 }
 0x2f2 PF: > { %p12_p7 = scmp.ge.s32.totalorder %s1704_s17, 4   ;;  %s2340_s12 = smov %s1630_s13 }
 0x2f3   : > { %s2341_s13 = smov %s1634_s14  ;;  %s2342_s14 = smov %s1714_s20 }
 0x2f4   : > { %s2343_s15 = smov %s1704_s17  ;;  %14 = sbr.rel (!%p12_p7) target bundleno = 3 (0x3), region = 82 }
 0x2fb   :  { %1286 = vsyncpa [#allocation4], 1 }
 0x2fc   :  { %1288 = vsyncpa [#allocation4 + $0x1], 1 }
 0x2fd   :  { %1289 = vsyncpa [#allocation6], 1 }

</bundles_post_ra>
